<compile_context>
chip_gen: v7x
topology: tpu7x:2x2x1
jax: 0.10.0
libtpu: 0.0.40
codegen_flags: <defaults>
</compile_context>

<pallas_src>
import jax
import jax.numpy as jnp
from jax.experimental import pallas as pl
from jax.experimental.pallas import tpu as pltpu


def _soft_attention_kernel(enc_ref,    # (Bt, P, E)  encoder features tile
                           dec_ref,    # (Bt, D)     decoder hidden tile
                           wenc_ref,   # (E, A)
                           wdec_ref,   # (D, A)
                           bias_ref,   # (1, A)      b_enc + b_dec (combined)
                           watt_ref,   # (1, A)      common_attention weight row
                           ctx_ref,    # (Bt, E)     attention-weighted features
                           alpha_ref): # (Bt, P)     softmax attention weights
    Bt, P, E = enc_ref.shape
    A = wenc_ref.shape[1]

    enc = enc_ref[...]                                   # (Bt, P, E), compute dtype
    # Layout-free flatten when P % 8 == 0 (f32) / P % 16 == 0 (bf16).
    enc_flat = enc.reshape(Bt * P, E)

    # encoder_layer over the whole batch tile: one MXU matmul with M = Bt*P
    # rows, f32 accumulation.
    enc_att = jnp.dot(enc_flat, wenc_ref[...],
                      preferred_element_type=jnp.float32).reshape(Bt, P, A)

    # decoder_layer + combined (b_enc + b_dec) bias, once per batch row.
    dec_att = jnp.dot(dec_ref[...], wdec_ref[...],
                      preferred_element_type=jnp.float32) + bias_ref[...]   # (Bt, A)

    # Tile-wide relu(enc_att + dec_att.unsqueeze(1)).
    act = jnp.maximum(enc_att + dec_att[:, None, :], 0.0)            # (Bt, P, A)

    # common_attention (an N=1 matmul) as one VPU multiply + one lane reduce.
    # b_att is omitted: the softmax below is shift-invariant.
    scores = jnp.sum(act * watt_ref[...], axis=-1, keepdims=True)    # (Bt, P, 1)

    # Batched softmax over the pixel (sublane) axis — one reduction of each
    # kind for the whole tile.
    m = jnp.max(scores, axis=1, keepdims=True)                       # (Bt, 1, 1)
    e = jnp.exp(scores - m)                                          # (Bt, P, 1)
    denom = jnp.sum(e, axis=1, keepdims=True)                        # (Bt, 1, 1)
    alpha = e * pl.reciprocal(denom, approx=False)                   # (Bt, P, 1)

    # Context: alpha stays in sublane layout and lane-broadcasts for free
    # against the encoder tile; one sublane reduce over P (no M=1 MXU matmul).
    ctx = jnp.sum(enc.astype(jnp.float32) * alpha, axis=1)           # (Bt, E)

    # One dense store per output per grid step.
    ctx_ref[...] = ctx.astype(ctx_ref.dtype)
    # Single sublane->lane relayout of alpha for the (Bt, P) store.
    alpha_ref[...] = alpha.reshape(Bt, P).astype(alpha_ref.dtype)


def _tile_vmem_bytes(Bt, P, E, D, A, itemsize):
    """Rough per-step VMEM footprint (BlockSpec double-buffers every block)."""
    in_bytes = 2 * (Bt * P * E + Bt * D) * itemsize            # enc + dec tiles
    w_bytes = 2 * ((E + D) * A * itemsize + 2 * A * 4)         # weights + bias rows
    out_bytes = 2 * (Bt * E + Bt * P) * 4                      # ctx + alpha tiles
    scratch = 4 * (2 * Bt * P * A + Bt * P * E + Bt * (A + E + P))  # f32 temps
    return in_bytes + w_bytes + out_bytes + scratch


def _has_two_tensorcores():
    """v7x has 2 TensorCores per chip; an even 'parallel' grid keeps both fed."""
    try:
        return "v7" in jax.devices()[0].device_kind.lower()
    except Exception:
        return False


def _pick_batch_tile(B, P, E, D, A, itemsize, budget, prefer_even_grid):
    """Largest Bt that (i) divides B, (ii) keeps the (Bt, *) blocks legal
    (Bt % 8 == 0 or Bt == B), (iii) fits the VMEM budget.  On 2-TC chips
    prefer an even number of grid steps so both cores get work; on 1-TC chips
    a single step minimizes per-step overhead."""
    divs = [d for d in range(1, B + 1)
            if B % d == 0 and (d % 8 == 0 or d == B)]
    fits = [d for d in divs
            if _tile_vmem_bytes(d, P, E, D, A, itemsize) <= budget] or [min(divs)]
    if prefer_even_grid:
        even = [d for d in fits if (B // d) % 2 == 0]
        if even:
            return max(even)
    return max(fits)


def soft_attention(encoder_out, decoder_hidden, params, *,
                   batch_tile=None, compute_dtype=None):
    """encoder_out: [B, P, E]; decoder_hidden: [B, D].
    Returns (encoder_out_with_attention [B, E], alpha [B, P]) in float32."""
    B, P, E = encoder_out.shape
    D = decoder_hidden.shape[1]
    A = params["w_enc"].shape[1]

    # TODO(synk): support n_pixels not a multiple of 8 (e.g. 196) by padding P
    # to a multiple of 8/16 and masking the padded scores to -inf pre-softmax.
    if P % 8 != 0:
        raise NotImplementedError("n_pixels must be a multiple of 8")

    if compute_dtype is None:
        compute_dtype = encoder_out.dtype
    itemsize = jnp.dtype(compute_dtype).itemsize
    # Note: for 16-bit compute dtypes the (Bt, P, E) -> (Bt*P, E) flatten is
    # relayout-free only when P % 16 == 0 (perf only; numerics unaffected).

    # Budget for tile selection; the actual limit is clamped to 48 MiB so it
    # stays under v7x's 64 MiB physical VMEM while leaving headroom.
    budget = 40 * 2**20
    if batch_tile is None:
        batch_tile = _pick_batch_tile(B, P, E, D, A, itemsize, budget,
                                      prefer_even_grid=_has_two_tensorcores())
    Bt = batch_tile
    assert B % Bt == 0 and (Bt % 8 == 0 or Bt == B)
    grid = (B // Bt,)

    enc = encoder_out.astype(compute_dtype)
    dec = decoder_hidden.astype(compute_dtype)
    w_enc = params["w_enc"].astype(compute_dtype)
    w_dec = params["w_dec"].astype(compute_dtype)
    # b_enc + b_dec combined (added once per batch row).  b_att is not passed:
    # softmax is shift-invariant, so dropping it leaves both outputs unchanged.
    bias = (params["b_enc"] + params["b_dec"]).astype(jnp.float32)   # (1, A)
    w_att = params["w_att"].reshape(1, A).astype(jnp.float32)        # (1, A)

    needed = _tile_vmem_bytes(Bt, P, E, D, A, itemsize)
    vmem_limit = int(min(max(needed + (4 << 20), 16 << 20), 48 << 20))

    ctx, alpha = pl.pallas_call(
        _soft_attention_kernel,
        out_shape=(jax.ShapeDtypeStruct((B, E), jnp.float32),
                   jax.ShapeDtypeStruct((B, P), jnp.float32)),
        grid_spec=pltpu.PrefetchScalarGridSpec(
            num_scalar_prefetch=0,
            grid=grid,
            in_specs=[
                pl.BlockSpec((Bt, P, E), lambda b: (b, 0, 0)),   # encoder_out
                pl.BlockSpec((Bt, D), lambda b: (b, 0)),         # decoder_hidden
                pl.BlockSpec((E, A), lambda b: (0, 0)),          # W_enc
                pl.BlockSpec((D, A), lambda b: (0, 0)),          # W_dec
                pl.BlockSpec((1, A), lambda b: (0, 0)),          # b_enc + b_dec
                pl.BlockSpec((1, A), lambda b: (0, 0)),          # w_att row
            ],
            out_specs=[
                pl.BlockSpec((Bt, E), lambda b: (b, 0)),         # context
                pl.BlockSpec((Bt, P), lambda b: (b, 0)),         # alpha
            ],
        ),
        compiler_params=pltpu.CompilerParams(
            dimension_semantics=("parallel",),
            vmem_limit_bytes=vmem_limit),
    )(enc, dec, w_enc, w_dec, bias, w_att)

    return ctx, alpha


def init_params(key, encoder_dim, decoder_hidden_dim, attention_dim):
    """Deterministic synthetic init (mimics nn.Linear uniform fan-in init)."""
    ks = jax.random.split(key, 6)

    def uni(k, shape, fan_in):
        bound = 1.0 / jnp.sqrt(fan_in)
        return jax.random.uniform(k, shape, jnp.float32, -bound, bound)

    return {
        "w_enc": uni(ks[0], (encoder_dim, attention_dim), encoder_dim),
        "b_enc": uni(ks[1], (1, attention_dim), encoder_dim),
        "w_dec": uni(ks[2], (decoder_hidden_dim, attention_dim), decoder_hidden_dim),
        "b_dec": uni(ks[3], (1, attention_dim), decoder_hidden_dim),
        "w_att": uni(ks[4], (attention_dim, 1), attention_dim),
        "b_att": uni(ks[5], (1, 1), attention_dim),   # no-op for outputs
    }


def soft_attention_ref(encoder_out, decoder_hidden, params):
    """Plain-JAX reference matching the PyTorch module (keeps b_att)."""
    enc_att = encoder_out @ params["w_enc"] + params["b_enc"][0]
    dec_att = decoder_hidden @ params["w_dec"] + params["b_dec"][0]
    act = jnp.maximum(enc_att + dec_att[:, None, :], 0.0)
    scores = (act @ params["w_att"])[..., 0] + params["b_att"][0, 0]
    alpha = jax.nn.softmax(scores, axis=1)
    ctx = (encoder_out * alpha[:, :, None]).sum(axis=1)
    return ctx, alpha


if __name__ == "__main__":
    # Small shapes consistent with the module's forward semantics:
    # batch=16, n_pixels=16 (emb_img_size=4), encoder_dim=128,
    # decoder_hidden_dim=64, attention_dim=64.
    B, P, E, D, A = 16, 16, 128, 64, 64

    key = jax.random.PRNGKey(0)
    k_enc, k_dec, k_param = jax.random.split(key, 3)

    encoder_out = jax.random.normal(k_enc, (B, P, E), jnp.float32)
    decoder_hidden = jax.random.normal(k_dec, (B, D), jnp.float32)
    params = init_params(k_param, E, D, A)

    ctx_ref, alpha_ref = soft_attention_ref(encoder_out, decoder_hidden, params)

    # float32 path.
    ctx, alpha = soft_attention(encoder_out, decoder_hidden, params)
    ctx, alpha = jax.block_until_ready((ctx, alpha))
    assert ctx.shape == (B, E) and alpha.shape == (B, P)
    assert jnp.allclose(ctx, ctx_ref, atol=1e-4, rtol=1e-4)
    assert jnp.allclose(alpha, alpha_ref, atol=1e-5, rtol=1e-4)
    assert jnp.allclose(alpha.sum(axis=1), 1.0, atol=1e-5)

    # bfloat16 compute path (halves encoder HBM traffic; f32 accumulation).
    ctx16, alpha16 = soft_attention(encoder_out, decoder_hidden, params,
                                    compute_dtype=jnp.bfloat16)
    ctx16, alpha16 = jax.block_until_ready((ctx16, alpha16))
    assert jnp.allclose(ctx16, ctx_ref, atol=5e-2, rtol=5e-2)
    assert jnp.allclose(alpha16, alpha_ref, atol=1e-2, rtol=1e-2)
    assert jnp.allclose(alpha16.sum(axis=1), 1.0, atol=1e-4)

    print("KERNEL_OK")
</pallas_src>

<mosaic_0001>
module attributes {stable_mosaic.version = 11 : i64} {
  func.func @_soft_attention_kernel(%arg0: i32, %arg1: memref<16x16x128xf32, #tpu.memory_space<vmem>>, %arg2: memref<16x64xf32, #tpu.memory_space<vmem>>, %arg3: memref<128x64xf32, #tpu.memory_space<vmem>>, %arg4: memref<64x64xf32, #tpu.memory_space<vmem>>, %arg5: memref<1x64xf32, #tpu.memory_space<vmem>>, %arg6: memref<1x64xf32, #tpu.memory_space<vmem>>, %arg7: memref<16x128xf32, #tpu.memory_space<vmem>>, %arg8: memref<16x16xf32, #tpu.memory_space<vmem>>) attributes {dimension_semantics = [#tpu.dimension_semantics<parallel>], iteration_bounds = array<i64: 1>, scalar_prefetch = 0 : i64, scratch_operands = 0 : i64, tpu.core_type = #tpu.core_type<tc>, window_params = [{transform_indices = @transform_0, window_bounds = array<i64: 16, 16, 128>}, {transform_indices = @transform_1, window_bounds = array<i64: 16, 64>}, {pipeline_mode = #tpu.pipeline_mode<synchronous>, transform_indices = @transform_2, window_bounds = array<i64: 128, 64>}, {pipeline_mode = #tpu.pipeline_mode<synchronous>, transform_indices = @transform_3, window_bounds = array<i64: 64, 64>}, {pipeline_mode = #tpu.pipeline_mode<synchronous>, transform_indices = @transform_4, window_bounds = array<i64: 1, 64>}, {pipeline_mode = #tpu.pipeline_mode<synchronous>, transform_indices = @transform_5, window_bounds = array<i64: 1, 64>}, {transform_indices = @transform_6, window_bounds = array<i64: 16, 128>}, {transform_indices = @transform_7, window_bounds = array<i64: 16, 16>}]} {
    %c0 = arith.constant 0 : index
    %c0_0 = arith.constant 0 : index
    %c0_1 = arith.constant 0 : index
    %0 = vector.load %arg1[%c0, %c0_0, %c0_1] : memref<16x16x128xf32, #tpu.memory_space<vmem>>, vector<16x16x128xf32>
    %1 = vector.shape_cast %0 : vector<16x16x128xf32> to vector<256x128xf32>
    %c0_2 = arith.constant 0 : index
    %c0_3 = arith.constant 0 : index
    %2 = vector.load %arg3[%c0_2, %c0_3] : memref<128x64xf32, #tpu.memory_space<vmem>>, vector<128x64xf32>
    %cst = arith.constant dense<0.000000e+00> : vector<256x64xf32>
    %3 = tpu.matmul %1, %2, %cst {dimension_numbers = #tpu.dot_dimension_numbers<[1], [0], [0], [1], [0, 0, 1, 1], [], []>} : vector<256x128xf32>, vector<128x64xf32>, vector<256x64xf32> -> vector<256x64xf32>
    %4 = vector.shape_cast %3 : vector<256x64xf32> to vector<16x16x64xf32>
    %c0_4 = arith.constant 0 : index
    %c0_5 = arith.constant 0 : index
    %5 = vector.load %arg2[%c0_4, %c0_5] : memref<16x64xf32, #tpu.memory_space<vmem>>, vector<16x64xf32>
    %c0_6 = arith.constant 0 : index
    %c0_7 = arith.constant 0 : index
    %6 = vector.load %arg4[%c0_6, %c0_7] : memref<64x64xf32, #tpu.memory_space<vmem>>, vector<64x64xf32>
    %cst_8 = arith.constant dense<0.000000e+00> : vector<16x64xf32>
    %7 = tpu.matmul %5, %6, %cst_8 {dimension_numbers = #tpu.dot_dimension_numbers<[1], [0], [0], [1], [0, 0, 1, 1], [], []>} : vector<16x64xf32>, vector<64x64xf32>, vector<16x64xf32> -> vector<16x64xf32>
    %c0_9 = arith.constant 0 : index
    %c0_10 = arith.constant 0 : index
    %8 = vector.load %arg5[%c0_9, %c0_10] : memref<1x64xf32, #tpu.memory_space<vmem>>, vector<1x64xf32>
    %9 = vector.broadcast %8 : vector<1x64xf32> to vector<16x64xf32>
    %10 = arith.addf %7, %9 : vector<16x64xf32>
    %11 = vector.shape_cast %10 : vector<16x64xf32> to vector<16x1x64xf32>
    %12 = vector.broadcast %11 : vector<16x1x64xf32> to vector<16x16x64xf32>
    %13 = arith.addf %4, %12 : vector<16x16x64xf32>
    %cst_11 = arith.constant 0.000000e+00 : f32
    %14 = vector.broadcast %cst_11 : f32 to vector<16x16x64xf32>
    %15 = arith.maximumf %13, %14 : vector<16x16x64xf32>
    %c0_12 = arith.constant 0 : index
    %c0_13 = arith.constant 0 : index
    %16 = vector.load %arg6[%c0_12, %c0_13] : memref<1x64xf32, #tpu.memory_space<vmem>>, vector<1x64xf32>
    %17 = vector.shape_cast %16 : vector<1x64xf32> to vector<1x1x64xf32>
    %18 = vector.broadcast %17 : vector<1x1x64xf32> to vector<16x16x64xf32>
    %19 = arith.mulf %15, %18 : vector<16x16x64xf32>
    %cst_14 = arith.constant dense<0.000000e+00> : vector<16x16xf32>
    %20 = vector.multi_reduction <add>, %19, %cst_14 [2] : vector<16x16x64xf32> to vector<16x16xf32>
    %21 = vector.shape_cast %20 : vector<16x16xf32> to vector<16x16x1xf32>
    %cst_15 = arith.constant dense<0xFF800000> : vector<16x1xf32>
    %22 = vector.multi_reduction <maximumf>, %21, %cst_15 [1] : vector<16x16x1xf32> to vector<16x1xf32>
    %23 = vector.shape_cast %22 : vector<16x1xf32> to vector<16x1x1xf32>
    %24 = vector.broadcast %23 : vector<16x1x1xf32> to vector<16x16x1xf32>
    %25 = arith.subf %21, %24 : vector<16x16x1xf32>
    %26 = math.exp %25 : vector<16x16x1xf32>
    %cst_16 = arith.constant dense<0.000000e+00> : vector<16x1xf32>
    %27 = vector.multi_reduction <add>, %26, %cst_16 [1] : vector<16x16x1xf32> to vector<16x1xf32>
    %28 = vector.shape_cast %27 : vector<16x1xf32> to vector<16x1x1xf32>
    %29 = tpu.reciprocal %28 : vector<16x1x1xf32> -> vector<16x1x1xf32>
    %30 = vector.broadcast %29 : vector<16x1x1xf32> to vector<16x16x1xf32>
    %31 = arith.mulf %26, %30 : vector<16x16x1xf32>
    %32 = vector.broadcast %31 : vector<16x16x1xf32> to vector<16x16x128xf32>
    %33 = arith.mulf %0, %32 : vector<16x16x128xf32>
    %cst_17 = arith.constant dense<0.000000e+00> : vector<16x128xf32>
    %34 = vector.multi_reduction <add>, %33, %cst_17 [1] : vector<16x16x128xf32> to vector<16x128xf32>
    %c0_18 = arith.constant 0 : index
    %c0_19 = arith.constant 0 : index
    %35 = vector.load %arg7[%c0_18, %c0_19] : memref<16x128xf32, #tpu.memory_space<vmem>>, vector<16x128xf32>
    tpu.vector_store %arg7[%c0_18, %c0_19], %34 {strides = array<i32>} : memref<16x128xf32, #tpu.memory_space<vmem>>, vector<16x128xf32>,
    %36 = vector.shape_cast %31 : vector<16x16x1xf32> to vector<16x16xf32>
    %c0_20 = arith.constant 0 : index
    %c0_21 = arith.constant 0 : index
    %37 = vector.load %arg8[%c0_20, %c0_21] : memref<16x16xf32, #tpu.memory_space<vmem>>, vector<16x16xf32>
    tpu.vector_store %arg8[%c0_20, %c0_21], %36 {strides = array<i32>} : memref<16x16xf32, #tpu.memory_space<vmem>>, vector<16x16xf32>,
    return
  }
  func.func @transform_0(%arg0: i32) -> (i32, i32, i32) {
    %c0_i32 = arith.constant 0 : i32
    %c0_i32_0 = arith.constant 0 : i32
    %c0_i32_1 = arith.constant 0 : i32
    return %arg0, %c0_i32, %c0_i32_0 : i32, i32, i32
  }
  func.func @transform_1(%arg0: i32) -> (i32, i32) {
    %c0_i32 = arith.constant 0 : i32
    %c0_i32_0 = arith.constant 0 : i32
    return %arg0, %c0_i32 : i32, i32
  }
  func.func @transform_2(%arg0: i32) -> (i32, i32) {
    %c0_i32 = arith.constant 0 : i32
    %c0_i32_0 = arith.constant 0 : i32
    %c0_i32_1 = arith.constant 0 : i32
    return %c0_i32, %c0_i32_0 : i32, i32
  }
  func.func @transform_3(%arg0: i32) -> (i32, i32) {
    %c0_i32 = arith.constant 0 : i32
    %c0_i32_0 = arith.constant 0 : i32
    %c0_i32_1 = arith.constant 0 : i32
    return %c0_i32, %c0_i32_0 : i32, i32
  }
  func.func @transform_4(%arg0: i32) -> (i32, i32) {
    %c0_i32 = arith.constant 0 : i32
    %c0_i32_0 = arith.constant 0 : i32
    %c0_i32_1 = arith.constant 0 : i32
    return %c0_i32, %c0_i32_0 : i32, i32
  }
  func.func @transform_5(%arg0: i32) -> (i32, i32) {
    %c0_i32 = arith.constant 0 : i32
    %c0_i32_0 = arith.constant 0 : i32
    %c0_i32_1 = arith.constant 0 : i32
    return %c0_i32, %c0_i32_0 : i32, i32
  }
  func.func @transform_6(%arg0: i32) -> (i32, i32) {
    %c0_i32 = arith.constant 0 : i32
    %c0_i32_0 = arith.constant 0 : i32
    return %arg0, %c0_i32 : i32, i32
  }
  func.func @transform_7(%arg0: i32) -> (i32, i32) {
    %c0_i32 = arith.constant 0 : i32
    %c0_i32_0 = arith.constant 0 : i32
    return %arg0, %c0_i32 : i32, i32
  }
}

</mosaic_0001>

<bundles_post_ra>
// kernel: tpu_custom_call.1
= control target key start
LH: loop header
LB: loop body
LE: loop exit
PB: predicated region body
PF: predicated region fallthrough
CT: control target
= control target key end

     0   :  { %13 = vsyncpa [#allocation3], 0  ;;  %s2873_s0 = inlined_call_operand.hbm [shape: f32[16,16,128], index: 0, kind: input, shape index: {}]   ;;  %s2874_s1 = inlined_call_operand.vmem [shape: f32[16,64], index: 1, kind: input, shape index: {}]   ;;  %s2875_s2 = inlined_call_operand.vmem [shape: f32[128,64], index: 2, kind: input, shape index: {}]   ;;  %s2876_s3 = inlined_call_operand.vmem [shape: f32[64,64], index: 3, kind: input, shape index: {}]   ;;  %s2877_s4 = inlined_call_operand.vmem [shape: f32[1,64], index: 4, kind: input, shape index: {}]   ;;  %s2878_s5 = inlined_call_operand.vmem [shape: f32[1,64], index: 5, kind: input, shape index: {}]   ;;  %s2879_s6 = inlined_call_operand.hbm [shape: f32[16,128], index: 6, kind: output, shape index: {0}]   ;;  %s2880_s7 = inlined_call_operand.hbm [shape: f32[16,16], index: 7, kind: output, shape index: {1}]  }
   0x1   :  { %14 = vsyncpa [#allocation4], 0 }
   0x2   :  { %15 = vsyncpa [#allocation7], 0  ;;  %s2006_s24 = smov [#allocation2]   ;;  %s1934_s28 = scalar_lea.hbm %s2873_s0, 4096 }
   0x3   :  { %s21_s25 = sshll.u32 %s2006_s24, 4  ;;  %p1935_p0 = scmp.ne.s32.totalorder %s2873_s0, %s1934_s28  ;;  %s22_s25 = int_to_ptr.vmem [resolvable:$true] %s21_s25 }
   0x4   :  { %p1938_p1 = scmp.lt.u32.totalorder %s1934_s28, %s2873_s0 }
   0x6   :  { %p1940_p2 = pnand %p1938_p1, %p1935_p0 }
   0x8   :  { %1943 = shalt.err (!%p1940_p2)
}
   0x9   :  { %s1944_s10 = scalar_lea.vmem %s22_s25, 4096  ;;  %p1949_p4 = scmp.lt.s32.totalorder %s22_s25, %s22_s25 }
   0xa   :  { %p1945_p3 = scmp.ne.s32.totalorder %s22_s25, %s1944_s10  ;;  %p1950_p5 = scmp.lt.s32.totalorder %s1944_s10, %s1944_s10 }
   0xc   :  { %p1951_p6 = por %p1950_p5, %p1949_p4 }
   0xe   :  { %p1952_p7 = pnand %p1951_p6, %p1945_p3 }
  0x10   :  { %1955 = shalt.err (!%p1952_p7)
}
  0x11   :  { %s2007_s11 = smov 128   ;;  %s2008_s12 = smov 8  }
  0x12   :  { %27 = dma.hbm_to_vmem [thread:$0]  %s2873_s0, 4096, %s22_s25, [#allocation3], %s2007_s11, %s2007_s11, %s2008_s12  }
  0x13   :  { %2000 = dma.done.wait [#allocation3], 4096  }
  0x14   :  { %2001 = vsyncadd [#allocation3], 4294963200  ;;  %v73_v0 = vld [vmem:[%s2875_s2] sm:$0xff]  ;;  %v74_v1 = vld [vmem:[%s2875_s2 + $0x8] sm:$0xff]  ;;  %vm331_vm0 = vcmask 523264   ;;  %vm1388_vm1 = vcmask 130112  }
  0x15   :  { %v75_v2 = vld [vmem:[%s2875_s2 + $0x10] sm:$0xff]  ;;  %v1738_v3 = vpack.c.bf16 %v74_v1, %v73_v0  ;;  %v76_v4 = vld [vmem:[%s2875_s2 + $0x18] sm:$0xff]  ;;  %v77_v6 = vld [vmem:[%s2875_s2 + $0x20] sm:$0xff]  ;;  %vm1320_vm2 = vcmask 1041409   ;;  %vm1322_vm3 = vcmask 1042434   ;;  %vm1324_vm4 = vcmask 1043459  }
  0x16   :  { %v1742_v5 = vpack.c.bf16 %v76_v4, %v75_v2  ;;  %v78_v7 = vld [vmem:[%s2875_s2 + $0x28] sm:$0xff]  ;;  %v59_v9 = vld [vmem:[#allocation2 + $0x90] sm:$0xff]  ;;  %v80_v11 = vld [vmem:[%s2875_s2 + $0x38] sm:$0xff]  ;;  %vm1326_vm5 = vcmask 1044484   ;;  %vm1328_vm6 = vcmask 1045509   ;;  %vm1330_vm7 = vcmask 1046534  }
  0x17   :  { %1786 = vmatprep.subr.bf16.mxu1 %v1738_v3  ;;  %1739 = vmatprep.subr.bf16.mxu0 %v1738_v3  ;;  %v1746_v8 = vpack.c.bf16 %v78_v7, %v77_v6  ;;  %v79_v10 = vld [vmem:[%s2875_s2 + $0x30] sm:$0xff]  ;;  %v41_v12 = vld [vmem:[#allocation2] sm:$0xff]  ;;  %v82_v15 = vld [vmem:[%s2875_s2 + $0x48] sm:$0xff]  ;;  %v419_v6 = vlaneseq  ;;  %vm1332_vm8 = vcmask 1047559   ;;  %vm1541_vm9 = vcmask 130048  }
  0x18   :  { %1794 = vmatpush3.bf16.msra.mxu1 %v1738_v3  ;;  %1741 = vmatpush3.bf16.msra.mxu0 %v1738_v3  ;;  %v1750_v13 = vpack.c.bf16 %v80_v11, %v79_v10  ;;  %v81_v14 = vld [vmem:[%s2875_s2 + $0x40] sm:$0xff]  ;;  %v83_v17 = vld [vmem:[%s2875_s2 + $0x50] sm:$0xff]  ;;  %v84_v18 = vld [vmem:[%s2875_s2 + $0x58] sm:$0xff] }
  0x19   :  { %1787 = vmatprep.subr.bf16.mxu1 %v1742_v5  ;;  %1743 = vmatprep.subr.bf16.mxu0 %v1742_v5  ;;  %v1754_v16 = vpack.c.bf16 %v82_v15, %v81_v14  ;;  %v1758_v19 = vpack.c.bf16 %v84_v18, %v83_v17  ;;  %v85_v20 = vld [vmem:[%s2875_s2 + $0x60] sm:$0xff]  ;;  %v86_v21 = vld [vmem:[%s2875_s2 + $0x68] sm:$0xff]  ;;  %v87_v23 = vld [vmem:[%s2875_s2 + $0x70] sm:$0xff]  ;;  %v420_v7 = vshrl.u32 %v419_v6, 7 }
  0x1a   :  { %1698 = vmatprep.mubr.f32.mxu1 %v59_v9  ;;  %1671 = vmatprep.mubr.f32.mxu0 %v41_v12  ;;  %v1762_v22 = vpack.c.bf16 %v86_v21, %v85_v20  ;;  %v88_v24 = vld [vmem:[%s2875_s2 + $0x78] sm:$0xff]  ;;  %v316_v26 = vld [vmem:[%s2876_s3] sm:$0xff]  ;;  %v317_v27 = vld [vmem:[%s2876_s3 + $0x8] sm:$0xff] }
  0x1b   :  { %v1766_v25 = vpack.c.bf16 %v88_v24, %v87_v23  ;;  %v1770_v28 = vpack.c.bf16 %v317_v27, %v316_v26  ;;  %v318_v29 = vld [vmem:[%s2876_s3 + $0x10] sm:$0xff]  ;;  %v319_v30 = vld [vmem:[%s2876_s3 + $0x18] sm:$0xff]  ;;  %v42_v32 = vld [vmem:[#allocation2 + $0x8] sm:$0xff] }
  0x1c   :  { %1795 = vmatpush3.bf16.msra.mxu1 %v1742_v5  ;;  %1745 = vmatpush3.bf16.msra.mxu0 %v1742_v5  ;;  %v60_v31 = vld [vmem:[#allocation2 + $0x98] sm:$0xff]  ;;  %v61_v33 = vld [vmem:[#allocation2 + $0xa0] sm:$0xff]  ;;  %v1774_v34 = vpack.c.bf16 %v319_v30, %v318_v29  ;;  %v43_v35 = vld [vmem:[#allocation2 + $0x10] sm:$0xff] }
  0x1d   :  { %1788 = vmatprep.subr.bf16.mxu1 %v1746_v8  ;;  %1747 = vmatprep.subr.bf16.mxu0 %v1746_v8  ;;  %v320_v36 = vld [vmem:[%s2876_s3 + $0x20] sm:$0xff]  ;;  %v321_v37 = vld [vmem:[%s2876_s3 + $0x28] sm:$0xff]  ;;  %v44_v39 = vld [vmem:[#allocation2 + $0x18] sm:$0xff] }
  0x1e   :  { %v62_v38 = vld [vmem:[#allocation2 + $0xa8] sm:$0xff]  ;;  %v63_v40 = vld [vmem:[#allocation2 + $0xb0] sm:$0xff]  ;;  %v1778_v41 = vpack.c.bf16 %v321_v37, %v320_v36  ;;  %v45_v42 = vld [vmem:[#allocation2 + $0x20] sm:$0xff] }
  0x1f   :  { %v322_v43 = vld [vmem:[%s2876_s3 + $0x30] sm:$0xff]  ;;  %v323_v44 = vld [vmem:[%s2876_s3 + $0x38] sm:$0xff]  ;;  %v46_v46 = vld [vmem:[#allocation2 + $0x28] sm:$0xff] }
  0x20   :  { %1796 = vmatpush3.bf16.msra.mxu1 %v1746_v8  ;;  %1749 = vmatpush3.bf16.msra.mxu0 %v1746_v8  ;;  %v64_v45 = vld [vmem:[#allocation2 + $0xb8] sm:$0xff]  ;;  %v65_v47 = vld [vmem:[#allocation2 + $0xc0] sm:$0xff]  ;;  %v47_v48 = vld [vmem:[#allocation2 + $0x30] sm:$0xff]  ;;  %v1782_v49 = vpack.c.bf16 %v323_v44, %v322_v43  ;;  %v1378_v8 = vand.u32 127, %v419_v6 }
  0x21   :  { %1789 = vmatprep.subr.bf16.mxu1 %v1750_v13  ;;  %1751 = vmatprep.subr.bf16.mxu0 %v1750_v13  ;;  %v66_v50 = vld [vmem:[#allocation2 + $0xc8] sm:$0xff]  ;;  %v48_v51 = vld [vmem:[#allocation2 + $0x38] sm:$0xff]  ;;  %v67_v52 = vld [vmem:[#allocation2 + $0xd0] sm:$0xff] }
  0x22   :  { %v49_v53 = vld [vmem:[#allocation2 + $0x40] sm:$0xff]  ;;  %v68_v54 = vld [vmem:[#allocation2 + $0xd8] sm:$0xff]  ;;  %v50_v55 = vld [vmem:[#allocation2 + $0x48] sm:$0xff]  ;;  %v2153_v9 = vsub.s32 %v1378_v8, %v420_v7  ;;  %v1383_v10 = vadd.s32 4294967288, %v1378_v8 }
  0x23   :  { %v69_v56 = vld [vmem:[#allocation2 + $0xe0] sm:$0xff]  ;;  %v51_v57 = vld [vmem:[#allocation2 + $0x50] sm:$0xff]  ;;  %v70_v58 = vld [vmem:[#allocation2 + $0xe8] sm:$0xff] }
  0x24   :  { %1797 = vmatpush3.bf16.msra.mxu1 %v1750_v13  ;;  %1753 = vmatpush3.bf16.msra.mxu0 %v1750_v13  ;;  %v52_v59 = vld [vmem:[#allocation2 + $0x58] sm:$0xff]  ;;  %v71_v60 = vld [vmem:[#allocation2 + $0xf0] sm:$0xff]  ;;  %v53_v61 = vld [vmem:[#allocation2 + $0x60] sm:$0xff]  ;;  %v2155_v11 = vsub.s32 %v1383_v10, %v420_v7 }
  0x25   :  { %1790 = vmatprep.subr.bf16.mxu1 %v1754_v16  ;;  %1755 = vmatprep.subr.bf16.mxu0 %v1754_v16  ;;  %v72_v62 = vld [vmem:[#allocation2 + $0xf8] sm:$0xff]  ;;  %v54_v63 = vld [vmem:[#allocation2 + $0x68] sm:$0xff]  ;;  %v314_v0 = vld [vmem:[%s2874_s1] sm:$0xff] }
  0x26   :  { %v55_v1 = vld [vmem:[#allocation2 + $0x70] sm:$0xff]  ;;  %v315_v2 = vld [vmem:[%s2874_s1 + $0x8] sm:$0xff]  ;;  %v56_v3 = vld [vmem:[#allocation2 + $0x78] sm:$0xff] }
  0x27   :  { %v2146_v4 = vld [vmem:[#allocation2 + $0x80] sm:$0xff]  ;;  %v2150_v5 = vld [vmem:[#allocation2 + $0x88] sm:$0xff] }
  0x28   :  { %1798 = vmatpush3.bf16.msra.mxu1 %v1754_v16  ;;  %1757 = vmatpush3.bf16.msra.mxu0 %v1754_v16  ;;  %v1577_v43 = vld [vmem:[%s2877_s4] ss:$0 sm:$0xff] }
  0x29   :  { %1791 = vmatprep.subr.bf16.mxu1 %v1758_v19  ;;  %1759 = vmatprep.subr.bf16.mxu0 %v1758_v19 }
  0x2c   :  { %1799 = vmatpush3.bf16.msra.mxu1 %v1758_v19  ;;  %1761 = vmatpush3.bf16.msra.mxu0 %v1758_v19 }
  0x2d   :  { %1792 = vmatprep.subr.bf16.mxu1 %v1762_v22  ;;  %1763 = vmatprep.subr.bf16.mxu0 %v1762_v22 }
  0x30   :  { %1800 = vmatpush3.bf16.msra.mxu1 %v1762_v22  ;;  %1765 = vmatpush3.bf16.msra.mxu0 %v1762_v22 }
  0x31   :  { %1793 = vmatprep.subr.bf16.mxu1 %v1766_v25  ;;  %1767 = vmatprep.subr.bf16.mxu0 %v1766_v25 }
  0x34   :  { %1801 = vmatpush3.bf16.msra.mxu1 %v1766_v25  ;;  %1769 = vmatpush3.bf16.msra.mxu0 %v1766_v25 }
  0x35   :  { %1771 = vmatprep.subr.bf16.mxu1 %v1770_v28 }
  0x37   :  { %1699 = vmatmul.mubr.f32.vlgmr.msra.gmra.mrb[0].mxu1 %v60_v31  ;;  %1672 = vmatmul.mubr.f32.vlgmr.msra.gmra.mrb[0].mxu0 %v42_v32  ;;  %v2009_v32 = vmov 1966171168  }
  0x38   :  { %1773 = vmatpush3.bf16.msra.mxu1 %v1770_v28  ;;  %1701 = vmatprep.mubr.f32.mxu1 %v61_v33  ;;  %v417_v33 = vunpack.c.l.s4 %v2009_v32 }
  0x39   :  { %1674 = vmatprep.mubr.f32.mxu0 %v43_v35  ;;  %1775 = vmatprep.subr.bf16.mxu1 %v1774_v34 }
  0x3b   :  { %1702 = vmatmul.mubr.f32.gmra.mrb[2].mxu1 %v62_v38  ;;  %1675 = vmatmul.mubr.f32.gmra.mrb[2].mxu0 %v44_v39  ;;  %v418_v38 = vunpack.c.0.s8 %v417_v33 }
  0x3c   :  { %1704 = vmatprep.mubr.f32.mxu1 %v63_v40  ;;  %1777 = vmatpush3.bf16.msra.mxu1 %v1774_v34 }
  0x3d   :  { %1677 = vmatprep.mubr.f32.mxu0 %v45_v42  ;;  %1779 = vmatprep.subr.bf16.mxu1 %v1778_v41  ;;  %v2210_v44 = vsub.s32 %v418_v38, %v420_v7 }
  0x3f   :  { %1705 = vmatmul.mubr.f32.gmra.mrb[4].mxu1 %v64_v45  ;;  %1678 = vmatmul.mubr.f32.gmra.mrb[4].mxu0 %v46_v46 }
  0x40   :  { %1707 = vmatprep.mubr.f32.mxu1 %v65_v47  ;;  %1680 = vmatprep.mubr.f32.mxu0 %v47_v48 }
  0x41   :  { %1781 = vmatpush3.bf16.msra.mxu1 %v1778_v41 }
  0x42   :  { %1783 = vmatprep.subr.bf16.mxu1 %v1782_v49 }
  0x43   :  { %1708 = vmatmul.mubr.f32.gmra.mrb[6].mxu1 %v66_v50  ;;  %1681 = vmatmul.mubr.f32.gmra.mrb[6].mxu0 %v48_v51 }
  0x44   :  { %1710 = vmatprep.mubr.f32.mxu1 %v67_v52  ;;  %1683 = vmatprep.mubr.f32.mxu0 %v49_v53 }
  0x45   :  { %1785 = vmatpush3.bf16.msra.mxu1 %v1782_v49 }
  0x47   :  { %1711 = vmatmul.mubr.f32.gmra.mrb[8].mxu1 %v68_v54  ;;  %1684 = vmatmul.mubr.f32.gmra.mrb[8].mxu0 %v50_v55 }
  0x48   :  { %1713 = vmatprep.mubr.f32.mxu1 %v69_v56  ;;  %1686 = vmatprep.mubr.f32.mxu0 %v51_v57 }
  0x4b   :  { %1714 = vmatmul.mubr.f32.gmra.mrb[10].mxu1 %v70_v58  ;;  %1687 = vmatmul.mubr.f32.gmra.mrb[10].mxu0 %v52_v59  ;;  %v2217_v58 = vsub.s32 0, %v420_v7 }
  0x4c   :  { %1716 = vmatprep.mubr.f32.mxu1 %v71_v60  ;;  %1689 = vmatprep.mubr.f32.mxu0 %v53_v61 }
  0x4f   :  { %1717 = vmatmul.mubr.f32.gmra.mrb[12].mxu1 %v72_v62  ;;  %1690 = vmatmul.mubr.f32.gmra.mrb[12].mxu0 %v54_v63 }
  0x50   :  { %1735 = vmatprep.mubr.msk.f32.mxu1 %vm331_vm0, %v314_v0  ;;  %1692 = vmatprep.mubr.f32.mxu0 %v55_v1 }
  0x53   :  { %1736 = vmatmul.mubr.msk.f32.vlgmr.msra.gmra.mrb[14].mxu1 %vm331_vm0, %v315_v2  ;;  %1693 = vmatmul.mubr.f32.gmra.mrb[14].mxu0 %v56_v3 }
  0x54   :  { %1695 = vmatprep.mubr.f32.mxu0 %v2146_v4 }
  0x57   :  { %1696 = vmatmul.mubr.f32.gmra.mrb[16].mxu0 %v2150_v5 }
 0x10a   :  { %v2157_v12 = vpop.f32.mrb[0].mxu1  ;;  %v1673_v13 = vpop.f32.mrb[0].mxu0 }
 0x10b   :  { %v2159_v14 = vpop.f32.mrb[1].mxu1  ;;  %v155_v15 = vpop.f32.mrb[1].mxu0 }
 0x10e   :  { %v2161_v16 = vpop.f32.mrb[2].mxu1  ;;  %v2163_v17 = vpop.f32.mrb[2].mxu0 }
 0x10f   :  { %v2165_v18 = vpop.f32.mrb[3].mxu1  ;;  %v2167_v19 = vpop.f32.mrb[3].mxu0 }
 0x112   :  { %v2169_v20 = vpop.f32.mrb[4].mxu1  ;;  %v2171_v21 = vpop.f32.mrb[4].mxu0 }
 0x113   :  { %v2173_v22 = vpop.f32.mrb[5].mxu1  ;;  %v2175_v23 = vpop.f32.mrb[5].mxu0 }
 0x116   :  { %v1709_v24 = vpop.f32.mrb[6].mxu1  ;;  %v2177_v25 = vpop.f32.mrb[6].mxu0 }
 0x117   :  { %v2179_v26 = vpop.f32.mrb[7].mxu1  ;;  %v2181_v27 = vpop.f32.mrb[7].mxu0 }
 0x11a   :  { %v2183_v28 = vpop.f32.mrb[8].mxu1  ;;  %v2185_v29 = vpop.f32.mrb[8].mxu0 }
 0x11b   :  { %v2187_v30 = vpop.f32.mrb[9].mxu1  ;;  %v2189_v31 = vpop.f32.mrb[9].mxu0 }
 0x11e   :  { %v2191_v34 = vpop.f32.mrb[10].mxu1  ;;  %v2193_v35 = vpop.f32.mrb[10].mxu0 }
 0x11f   :  { %v2195_v36 = vpop.f32.mrb[11].mxu1  ;;  %v2197_v37 = vpop.f32.mrb[11].mxu0 }
 0x122   :  { %v2199_v39 = vpop.f32.mrb[12].mxu1  ;;  %v2201_v40 = vpop.f32.mrb[12].mxu0 }
 0x123   :  { %v2203_v41 = vpop.f32.mrb[13].mxu1  ;;  %v2205_v42 = vpop.f32.mrb[13].mxu0 }
 0x126   :  { %v1737_v45 = vpop.f32.mrb[14].mxu1  ;;  %v1694_v46 = vpop.f32.mrb[14].mxu0 }
 0x127   :  { %v410_v47 = vadd.f32 %v1737_v45, %v1577_v43  ;;  %v404_v48 = vpop.f32.mrb[15].mxu1  ;;  %v225_v49 = vpop.f32.mrb[15].mxu0 }
 0x128   :  { %v405_v50 = vadd.f32 %v1577_v43, %v404_v48 }
 0x129   :  { %v464_v51 = vcombine.high %v410_v47, %v410_v47  ;;  %v471_v52 = vrot.slane %v410_v47, %v2210_v44 }
 0x12a   :  { %v415_v53 = vcombine.high %v405_v50, %v405_v50  ;;  %v422_v54 = vrot.slane %v405_v50, %v2210_v44  ;;  %v1697_v55 = vpop.f32.mrb[16].mxu0  ;;  %v2241_v50 = vld [vmem:[%s2878_s5] ss:$0 sm:$0xff]  ;;  %s2010_s5 = smov [#allocation6]  }
 0x12b   :  { %v2215_v56 = vrot.slane %v464_v51, %v2210_v44  ;;  %v479_v57 = vcombine.high %v471_v52, %v471_v52  ;;  %v487_v59 = vrot.slane %v471_v52, %v2210_v44  ;;  %v235_v60 = vpop.f32.mrb[17].mxu0  ;;  %s1561_s0 = sshll.u32 %s2010_s5, 4  ;;  %s2811_s0 = int_to_ptr.vmem [resolvable:$true] %s1561_s0 }
 0x12c   :  { %v429_v61 = vrot.slane %v415_v53, %v2210_v44  ;;  %v438_v62 = vrot.slane %v422_v54, %v2210_v44  ;;  %v430_v6 = vcombine.high %v422_v54, %v422_v54  ;;  %s1956_s23 = scalar_lea.vmem %s2811_s0, 256  ;;  %p1961_p9 = scmp.lt.s32.totalorder %s2811_s0, %s2811_s0 }
 0x12d   :  { %v501_v63 = vrot.slane %v479_v57, %v2210_v44  ;;  %v509_v0 = vcombine.high %v487_v59, %v487_v59  ;;  %v2225_v1 = vrot.slane %v2215_v56, %v2210_v44  ;;  %v548_v8 = vrot.slane %v487_v59, %v2217_v58  ;;  %p1957_p8 = scmp.ne.s32.totalorder %s2811_s0, %s1956_s23  ;;  %p1962_p10 = scmp.lt.s32.totalorder %s1956_s23, %s1956_s23 }
 0x12e   :  { %v431_v2 = vcombine.high %v429_v61, %v429_v61  ;;  %v516_v3 = vrot.slane %v438_v62, %v2217_v58  ;;  %v460_v59 = vcombine.high %v438_v62, %v438_v62 }
 0x12f   :  { %v552_v10 = vrot.slane %v501_v63, %v2217_v58  ;;  %v556_v33 = vrot.slane %v509_v0, %v2217_v58  ;;  %v610_v45 = vadd.f32 %v1697_v55, %v548_v8  ;;  %v609_v47 = vadd.f32 %v548_v8, %v235_v60  ;;  %p1963_p11 = por %p1962_p10, %p1961_p9 }
 0x130   :  { %v2229_v7 = vrot.slane %v431_v2, %v2210_v44  ;;  %v593_v32 = vadd.f32 %v516_v3, %v155_v15  ;;  %v594_v38 = vadd.f32 %v1673_v13, %v516_v3  ;;  %v564_v48 = vrot.slane %v2225_v1, %v2217_v58 }
 0x131   :  { %v612_v51 = vadd.f32 %v2157_v12, %v552_v10  ;;  %v614_v15 = vadd.f32 %v2161_v16, %v556_v33  ;;  %v642_v53 = vmax.f32 %v610_v45, 0.0  ;;  %v641_v54 = vmax.f32 %v609_v47, 0.0  ;;  %p1964_p12 = pnand %p1963_p11, %p1957_p8 }
 0x132   :  { %v463_v43 = vcombine.high %v2229_v7, %v2229_v7  ;;  %v625_v52 = vmax.f32 %v593_v32, 0.0  ;;  %v618_v57 = vadd.f32 %v1709_v24, %v564_v48  ;;  %v2247_v55 = vrot.slane %v430_v6, %v2210_v44 }
 0x133   :  { %v644_v60 = vmax.f32 %v612_v51, 0.0  ;;  %v626_v0 = vmax.f32 %v594_v38, 0.0  ;;  %v681_v12 = vmul.f32 %v2241_v50, %v642_v53  ;;  %v680_v8 = vmul.f32 %v2241_v50, %v641_v54 }
 0x134   :  { %v544_v13 = vrot.slane %v463_v43, %v2217_v58  ;;  %v2256_v16 = vrot.slane %v429_v61, %v2210_v44  ;;  %v664_v32 = vmul.f32 %v2241_v50, %v625_v52  ;;  %v646_v24 = vmax.f32 %v614_v15, 0.0 }
 0x135   :  { %v480_v6 = vcombine.high %v2215_v56, %v2215_v56  ;;  %v747_v62 = vsel %vm331_vm0, %v681_v12, 0.0  ;;  %v511_v38 = vcombine.high %v501_v63, %v501_v63  ;;  %v665_v43 = vmul.f32 %v2241_v50, %v626_v0 }
 0x136   :  { %v2249_v2 = vadd.f32 %v1694_v46, %v544_v13  ;;  %v2251_v3 = vadd.f32 %v544_v13, %v225_v49  ;;  %v744_v46 = vsel %vm331_vm0, %v680_v8, 0.0  ;;  %v683_v49 = vmul.f32 %v2241_v50, %v644_v60  ;;  %748 = vadd.xlane.f32.xlu1 %v747_v62 }
 0x137   :  { %745 = vadd.xlane.f32.xlu0 %v744_v46  ;;  %v611_v61 = vadd.f32 %v552_v10, %v2159_v14  ;;  %v520_v45 = vrot.slane %v2247_v55, %v2217_v58  ;;  %v613_v47 = vadd.f32 %v556_v33, %v2165_v18  ;;  %v617_v56 = vadd.f32 %v564_v48, %v2179_v26 }
 0x138   :  { %v524_v51 = vrot.slane %v460_v59, %v2217_v58  ;;  %v696_v52 = vsel %vm331_vm0, %v664_v32, 0.0  ;;  %v685_v15 = vmul.f32 %v2241_v50, %v646_v24  ;;  %v650_v63 = vmax.f32 %v618_v57, 0.0 }
 0x139   :  { %v532_v13 = vrot.slane %v2256_v16, %v2217_v58  ;;  %v753_v53 = vsel %vm331_vm0, %v683_v49, 0.0  ;;  %v643_v14 = vmax.f32 %v611_v61, 0.0  ;;  %v595_v10 = vadd.f32 %v520_v45, %v2167_v19 }
 0x13a   :  { %v596_v54 = vadd.f32 %v2163_v17, %v520_v45  ;;  %754 = vadd.xlane.f32.xlu1 %v753_v53  ;;  %v598_v18 = vadd.f32 %v2171_v21, %v524_v51  ;;  %v597_v26 = vadd.f32 %v524_v51, %v2175_v23  ;;  %v2281_v33 = vrot.slane %v480_v6, %v2210_v44 }
 0x13b   :  { %697 = vadd.xlane.f32.xlu0 %v696_v52  ;;  %v560_v48 = vrot.slane %v511_v38, %v2217_v58  ;;  %v510_v57 = vcombine.high %v2225_v1, %v2225_v1  ;;  %v689_v59 = vmul.f32 %v2241_v50, %v650_v63  ;;  %v645_v60 = vmax.f32 %v613_v47, 0.0 }
 0x13c   :  { %v602_v19 = vadd.f32 %v2185_v29, %v532_v13  ;;  %v759_v17 = vsel %vm331_vm0, %v685_v15, 0.0  ;;  %v699_v0 = vsel %vm331_vm0, %v665_v43, 0.0  ;;  %v682_v21 = vmul.f32 %v2241_v50, %v643_v14 }
 0x13d   :  { %v627_v23 = vmax.f32 %v595_v10, 0.0  ;;  %v462_v44 = vcombine.high %v2247_v55, %v2247_v55  ;;  %v601_v12 = vadd.f32 %v532_v13, %v2189_v31  ;;  %v616_v1 = vadd.f32 %v2169_v20, %v560_v48 }
 0x13e   :  { %760 = vadd.xlane.f32.xlu1 %v759_v17  ;;  %v615_v8 = vadd.f32 %v560_v48, %v2173_v22  ;;  %v771_v29 = vsel %vm331_vm0, %v689_v59, 0.0  ;;  %v684_v32 = vmul.f32 %v2241_v50, %v645_v60  ;;  %v628_v24 = vmax.f32 %v596_v54, 0.0 }
 0x13f   :  { %700 = vadd.xlane.f32.xlu0 %v699_v0  ;;  %v649_v6 = vmax.f32 %v617_v56, 0.0  ;;  %v750_v62 = vsel %vm331_vm0, %v682_v21, 0.0  ;;  %v666_v46 = vmul.f32 %v2241_v50, %v627_v23  ;;  %v568_v55 = vrot.slane %v2281_v33, %v2217_v58 }
 0x140   :  { %v572_v49 = vrot.slane %v510_v57, %v2217_v58  ;;  %v528_v20 = vrot.slane %v462_v44, %v2217_v58  ;;  %v630_v22 = vmax.f32 %v598_v18, 0.0  ;;  %v536_v43 = vrot.slane %v2229_v7, %v2217_v58 }
 0x141   :  { %v620_v31 = vadd.f32 %v2183_v28, %v568_v55  ;;  %v619_v38 = vadd.f32 %v568_v55, %v2187_v30  ;;  %v629_v61 = vmax.f32 %v597_v26, 0.0  ;;  %v702_v51 = vsel %vm331_vm0, %v666_v46, 0.0 }
 0x142   :  { %772 = vadd.xlane.f32.xlu1 %v771_v29  ;;  %v622_v45 = vadd.f32 %v2191_v34, %v572_v49  ;;  %v621_v47 = vadd.f32 %v572_v49, %v2195_v36  ;;  %v600_v56 = vadd.f32 %v2177_v25, %v528_v20  ;;  %v756_v52 = vsel %vm331_vm0, %v684_v32, 0.0 }
 0x143   :  { %751 = vadd.xlane.f32.xlu0 %v750_v62  ;;  %v667_v15 = vmul.f32 %v2241_v50, %v628_v24  ;;  %v688_v28 = vmul.f32 %v2241_v50, %v649_v6  ;;  %v599_v30 = vadd.f32 %v528_v20, %v2181_v27  ;;  %v461_v7 = vcombine.high %v2256_v16, %v2256_v16 }
 0x144   :  { %v669_v34 = vmul.f32 %v2241_v50, %v630_v22  ;;  %v604_v36 = vadd.f32 %v2193_v35, %v536_v43  ;;  %v603_v25 = vadd.f32 %v536_v43, %v2197_v37  ;;  %v668_v63 = vmul.f32 %v2241_v50, %v629_v61 }
 0x145   :  { %v634_v13 = vmax.f32 %v602_v19, 0.0  ;;  %v705_v53 = vsel %vm331_vm0, %v667_v15, 0.0  ;;  %v768_v14 = vsel %vm331_vm0, %v688_v28, 0.0  ;;  %v633_v10 = vmax.f32 %v601_v12, 0.0 }
 0x146   :  { %703 = vadd.xlane.f32.xlu1 %v702_v51  ;;  %v711_v27 = vsel %vm331_vm0, %v669_v34, 0.0  ;;  %v540_v16 = vrot.slane %v461_v7, %v2217_v58  ;;  %v708_v54 = vsel %vm331_vm0, %v668_v63, 0.0  ;;  %v648_v18 = vmax.f32 %v616_v1, 0.0 }
 0x147   :  { %757 = vadd.xlane.f32.xlu0 %v756_v52  ;;  %v673_v35 = vmul.f32 %v2241_v50, %v634_v13  ;;  %v512_v37 = vcombine.high %v2281_v33, %v2281_v33  ;;  %v672_v26 = vmul.f32 %v2241_v50, %v633_v10  ;;  %v647_v48 = vmax.f32 %v615_v8, 0.0 }
 0x148   :  { %v606_v57 = vadd.f32 %v2201_v40, %v540_v16  ;;  %v605_v59 = vadd.f32 %v540_v16, %v2205_v42  ;;  %v687_v17 = vmul.f32 %v2241_v50, %v648_v18  ;;  %v652_v44 = vmax.f32 %v620_v31, 0.0 }
 0x149   :  { %v576_v60 = vrot.slane %v512_v37, %v2217_v58  ;;  %v723_v19 = vsel %vm331_vm0, %v673_v35, 0.0  ;;  %v720_v33 = vsel %vm331_vm0, %v672_v26, 0.0  ;;  %v686_v23 = vmul.f32 %v2241_v50, %v647_v48 }
 0x14a   :  { %706 = vadd.xlane.f32.xlu1 %v705_v53  ;;  %v651_v40 = vmax.f32 %v619_v38, 0.0  ;;  %v765_v42 = vsel %vm331_vm0, %v687_v17, 0.0  ;;  %v654_v12 = vmax.f32 %v622_v45, 0.0  ;;  %v691_v1 = vmul.f32 %v2241_v50, %v652_v44 }
 0x14b   :  { %769 = vadd.xlane.f32.xlu0 %v768_v14  ;;  %v624_v0 = vadd.f32 %v2199_v39, %v576_v60  ;;  %v623_v21 = vadd.f32 %v576_v60, %v2203_v41  ;;  %v762_v58 = vsel %vm331_vm0, %v686_v23, 0.0  ;;  %v653_v39 = vmax.f32 %v621_v47, 0.0 }
 0x14c   :  { %v690_v8 = vmul.f32 %v2241_v50, %v651_v40  ;;  %v693_v41 = vmul.f32 %v2241_v50, %v654_v12  ;;  %v632_v29 = vmax.f32 %v600_v56, 0.0  ;;  %v777_v32 = vsel %vm331_vm0, %v691_v1, 0.0 }
 0x14d   :  { %v692_v6 = vmul.f32 %v2241_v50, %v653_v39  ;;  %v631_v62 = vmax.f32 %v599_v30, 0.0  ;;  %v636_v55 = vmax.f32 %v604_v36, 0.0  ;;  %v635_v31 = vmax.f32 %v603_v25, 0.0 }
 0x14e   :  { %712 = vadd.xlane.f32.xlu1 %v711_v27  ;;  %v774_v24 = vsel %vm331_vm0, %v690_v8, 0.0  ;;  %v671_v46 = vmul.f32 %v2241_v50, %v632_v29  ;;  %v783_v49 = vsel %vm331_vm0, %v693_v41, 0.0  ;;  %v638_v47 = vmax.f32 %v606_v57, 0.0 }
 0x14f   :  { %709 = vadd.xlane.f32.xlu0 %v708_v54  ;;  %v780_v20 = vsel %vm331_vm0, %v692_v6, 0.0  ;;  %v670_v22 = vmul.f32 %v2241_v50, %v631_v62  ;;  %v675_v43 = vmul.f32 %v2241_v50, %v636_v55  ;;  %v674_v45 = vmul.f32 %v2241_v50, %v635_v31 }
 0x150   :  { %v717_v38 = vsel %vm331_vm0, %v671_v46, 0.0  ;;  %v637_v56 = vmax.f32 %v605_v59, 0.0  ;;  %v640_v51 = vmax.f32 %v2249_v2, 0.0  ;;  %v639_v52 = vmax.f32 %v2251_v3, 0.0 }
 0x151   :  { %v714_v61 = vsel %vm331_vm0, %v670_v22, 0.0  ;;  %v729_v15 = vsel %vm331_vm0, %v675_v43, 0.0  ;;  %v726_v28 = vsel %vm331_vm0, %v674_v45, 0.0  ;;  %v677_v30 = vmul.f32 %v2241_v50, %v638_v47 }
 0x152   :  { %724 = vadd.xlane.f32.xlu1 %v723_v19  ;;  %v676_v7 = vmul.f32 %v2241_v50, %v637_v56  ;;  %v679_v34 = vmul.f32 %v2241_v50, %v640_v51  ;;  %v678_v36 = vmul.f32 %v2241_v50, %v639_v52  ;;  %v656_v63 = vmax.f32 %v624_v0, 0.0 }
 0x153   :  { %721 = vadd.xlane.f32.xlu0 %v720_v33  ;;  %v735_v25 = vsel %vm331_vm0, %v677_v30, 0.0  ;;  %v655_v3 = vmax.f32 %v623_v21, 0.0 }
 0x154   :  { %v732_v2 = vsel %vm331_vm0, %v676_v7, 0.0  ;;  %v741_v13 = vsel %vm331_vm0, %v679_v34, 0.0  ;;  %v738_v53 = vsel %vm331_vm0, %v678_v36, 0.0  ;;  %v695_v14 = vmul.f32 %v2241_v50, %v656_v63 }
 0x155   :  { %v694_v10 = vmul.f32 %v2241_v50, %v655_v3 }
 0x156   :  { %766 = vadd.xlane.f32.xlu1 %v765_v42  ;;  %v789_v27 = vsel %vm331_vm0, %v695_v14, 0.0 }
 0x157   :  { %763 = vadd.xlane.f32.xlu0 %v762_v58  ;;  %v786_v16 = vsel %vm331_vm0, %v694_v10, 0.0 }
 0x15a   :  { %778 = vadd.xlane.f32.xlu1 %v777_v32 }
 0x15b   :  { %775 = vadd.xlane.f32.xlu0 %v774_v24 }
 0x15e   :  { %784 = vadd.xlane.f32.xlu1 %v783_v49 }
 0x15f   :  { %781 = vadd.xlane.f32.xlu0 %v780_v20 }
 0x162   :  { %718 = vadd.xlane.f32.xlu1 %v717_v38 }
 0x163   :  { %715 = vadd.xlane.f32.xlu0 %v714_v61 }
 0x166   :  { %730 = vadd.xlane.f32.xlu1 %v729_v15 }
 0x167   :  { %727 = vadd.xlane.f32.xlu0 %v726_v28 }
 0x16a   :  { %736 = vadd.xlane.f32.xlu1 %v735_v25 }
 0x16b   :  { %733 = vadd.xlane.f32.xlu0 %v732_v2 }
 0x16e   :  { %742 = vadd.xlane.f32.xlu1 %v741_v13 }
 0x16f   :  { %739 = vadd.xlane.f32.xlu0 %v738_v53 }
 0x172   :  { %790 = vadd.xlane.f32.xlu1 %v789_v27 }
 0x173   :  { %787 = vadd.xlane.f32.xlu0 %v786_v16 }
 0x1c3   :  { %v749_v54 = vpop.xlane.xlu1 %748 }
 0x1c4   :  { %v746_v35 = vpop.xlane.xlu0 %745 }
 0x1c5   :  { %v848_v18 = vmax.f32 %v746_v35, %v749_v54 }
 0x1c7   :  { %v849_v37 = vrot.slane %v848_v18, 4  ;;  %v2372_v26 = vpop.xlane.xlu1 %754 }
 0x1c8   :  { %v698_v48 = vpop.xlane.xlu0 %697 }
 0x1c9   :  { %v850_v57 = vmax.f32 %v848_v18, %v849_v37 }
 0x1cb   :  { %v851_v59 = vrot.slane %v850_v57, 2  ;;  %v2374_v60 = vpop.xlane.xlu1 %760 }
 0x1cc   :  { %v701_v50 = vpop.xlane.xlu0 %700 }
 0x1cd   :  { %v852_v19 = vmax.f32 %v850_v57, %v851_v59  ;;  %v792_v17 = vmax.f32 %v698_v48, %v701_v50 }
 0x1cf   :  { %v853_v0 = vrot.slane %v852_v19, 1  ;;  %v793_v21 = vrot.slane %v792_v17, 4  ;;  %v2376_v33 = vpop.xlane.xlu1 %772 }
 0x1d0   :  { %v752_v23 = vpop.xlane.xlu0 %751 }
 0x1d1   :  { %v854_v44 = vmax.f32 %v852_v19, %v853_v0  ;;  %v794_v40 = vmax.f32 %v792_v17, %v793_v21  ;;  %v855_v42 = vmax.f32 %v752_v23, %v2372_v26 }
 0x1d3   :  { %v920_v12 = vsub.f32 %v746_v35, %v854_v44  ;;  %v921_v58 = vsub.f32 %v749_v54, %v854_v44  ;;  %v795_v1 = vrot.slane %v794_v40, 2  ;;  %v856_v8 = vrot.slane %v855_v42, 4  ;;  %v2379_v39 = vpop.xlane.xlu1 %703 }
 0x1d4   :  { %v2381_v41 = vpop.xlane.xlu0 %757 }
 0x1d5   :  { %v968_v29 = vmul.f32 1.442695, %v920_v12  ;;  %v970_v32 = vmul.f32 1.442695, %v921_v58  ;;  %v796_v24 = vmax.f32 %v794_v40, %v795_v1  ;;  %v857_v6 = vmax.f32 %v855_v42, %v856_v8 }
 0x1d6   :  { %v862_v62 = vmax.f32 %v2381_v41, %v2374_v60 }
 0x1d7   :  { %1808 = vpow2.f32 %v968_v29  ;;  %v797_v46 = vrot.slane %v796_v24, 1  ;;  %v858_v55 = vrot.slane %v857_v6, 2  ;;  %v2385_v20 = vpop.xlane.xlu1 %706 }
 0x1d8   :  { %1810 = vpow2.f32 %v970_v32  ;;  %v863_v49 = vrot.slane %v862_v62, 4  ;;  %v2387_v22 = vpop.xlane.xlu0 %769  ;;  %v799_v43 = vmax.f32 %v2379_v39, %v2385_v20 }
 0x1d9   :  { %v798_v31 = vmax.f32 %v796_v24, %v797_v46  ;;  %v859_v38 = vmax.f32 %v857_v6, %v858_v55  ;;  %v876_v61 = vmax.f32 %v2387_v22, %v2376_v33 }
 0x1da   :  { %v864_v45 = vmax.f32 %v862_v62, %v863_v49  ;;  %v800_v52 = vrot.slane %v799_v43, 4 }
 0x1db   :  { %v904_v47 = vsub.f32 %v698_v48, %v798_v31  ;;  %v905_v56 = vsub.f32 %v701_v50, %v798_v31  ;;  %v860_v51 = vrot.slane %v859_v38, 1  ;;  %v877_v28 = vrot.slane %v876_v61, 4  ;;  %v2393_v30 = vpop.xlane.xlu1 %712 }
 0x1dc   :  { %v865_v15 = vrot.slane %v864_v45, 2  ;;  %v2395_v7 = vpop.xlane.xlu0 %709  ;;  %v801_v2 = vmax.f32 %v799_v43, %v800_v52 }
 0x1dd   :  { %v936_v34 = vmul.f32 1.442695, %v904_v47  ;;  %v938_v36 = vmul.f32 1.442695, %v905_v56  ;;  %v861_v25 = vmax.f32 %v859_v38, %v860_v51  ;;  %v878_v3 = vmax.f32 %v876_v61, %v877_v28 }
 0x1de   :  { %v866_v63 = vmax.f32 %v864_v45, %v865_v15  ;;  %v806_v13 = vmax.f32 %v2395_v7, %v2393_v30  ;;  %v802_v10 = vrot.slane %v801_v2, 2 }
 0x1df   :  { %1812 = vpow2.f32 %v936_v34  ;;  %v922_v53 = vsub.f32 %v752_v23, %v861_v25  ;;  %v923_v14 = vsub.f32 %v2372_v26, %v861_v25  ;;  %v879_v16 = vrot.slane %v878_v3, 2  ;;  %v2400_v35 = vpop.xlane.xlu1 %724 }
 0x1e0   :  { %1814 = vpow2.f32 %v938_v36  ;;  %v867_v27 = vrot.slane %v866_v63, 1  ;;  %v807_v54 = vrot.slane %v806_v13, 4  ;;  %v2402_v18 = vpop.xlane.xlu0 %721  ;;  %v803_v59 = vmax.f32 %v801_v2, %v802_v10 }
 0x1e1   :  { %v2404_v37 = vpop.eup %1808  ;;  %v972_v48 = vmul.f32 1.442695, %v922_v53  ;;  %v974_v57 = vmul.f32 1.442695, %v923_v14  ;;  %v820_v50 = vmax.f32 %v2402_v18, %v2400_v35  ;;  %v880_v17 = vmax.f32 %v878_v3, %v879_v16 }
 0x1e2   :  { %v2408_v19 = vpop.eup %1810  ;;  %v868_v26 = vmax.f32 %v866_v63, %v867_v27  ;;  %v808_v0 = vmax.f32 %v806_v13, %v807_v54  ;;  %v804_v23 = vrot.slane %v803_v59, 1 }
 0x1e3   :  { %v1056_v21 = vadd.f32 %v2408_v19, %v2404_v37  ;;  %1816 = vpow2.f32 %v972_v48  ;;  %v821_v44 = vrot.slane %v820_v50, 4  ;;  %v881_v12 = vrot.slane %v880_v17, 1  ;;  %v2414_v58 = vpop.xlane.xlu1 %766 }
 0x1e4   :  { %1818 = vpow2.f32 %v974_v57  ;;  %v924_v40 = vsub.f32 %v2381_v41, %v868_v26  ;;  %v925_v42 = vsub.f32 %v2374_v60, %v868_v26  ;;  %v2416_v1 = vpop.xlane.xlu0 %763  ;;  %v805_v29 = vmax.f32 %v803_v59, %v804_v23 }
 0x1e5   :  { %v1057_v8 = vrot.slane %v1056_v21, 4  ;;  %v809_v32 = vrot.slane %v808_v0, 2  ;;  %v822_v24 = vmax.f32 %v820_v50, %v821_v44  ;;  %v882_v46 = vmax.f32 %v880_v17, %v881_v12 }
 0x1e6   :  { %v976_v6 = vmul.f32 1.442695, %v924_v40  ;;  %v978_v62 = vmul.f32 1.442695, %v925_v42  ;;  %v869_v55 = vmax.f32 %v2416_v1, %v2414_v58  ;;  %v906_v41 = vsub.f32 %v2379_v39, %v805_v29 }
 0x1e7   :  { %v1058_v49 = vadd.f32 %v1057_v8, %v1056_v21  ;;  %v907_v60 = vsub.f32 %v2385_v20, %v805_v29  ;;  %v810_v31 = vmax.f32 %v808_v0, %v809_v32  ;;  %v928_v38 = vsub.f32 %v2387_v22, %v882_v46  ;;  %v2426_v52 = vpop.xlane.xlu1 %778 }
 0x1e8   :  { %1820 = vpow2.f32 %v976_v6  ;;  %v929_v43 = vsub.f32 %v2376_v33, %v882_v46  ;;  %v823_v61 = vrot.slane %v822_v24, 2  ;;  %v940_v56 = vmul.f32 1.442695, %v906_v41  ;;  %v2428_v15 = vpop.xlane.xlu0 %775 }
 0x1e9   :  { %v2424_v45 = vpop.eup %1812  ;;  %v1059_v47 = vrot.slane %v1058_v49, 2  ;;  %1822 = vpow2.f32 %v978_v62  ;;  %v942_v51 = vmul.f32 1.442695, %v907_v60  ;;  %v984_v20 = vmul.f32 1.442695, %v928_v38 }
 0x1ea   :  { %v2430_v39 = vpop.eup %1814  ;;  %v986_v28 = vmul.f32 1.442695, %v929_v43  ;;  %v811_v34 = vrot.slane %v810_v31, 1  ;;  %v824_v36 = vmax.f32 %v822_v24, %v823_v61  ;;  %1824 = vpow2.f32 %v940_v56 }
 0x1eb   :  { %v1060_v22 = vadd.f32 %v1059_v47, %v1058_v49  ;;  %v1000_v33 = vadd.f32 %v2430_v39, %v2424_v45  ;;  %v870_v25 = vrot.slane %v869_v55, 4  ;;  %1826 = vpow2.f32 %v942_v51  ;;  %v2460_v47 = vpop.xlane.xlu1 %784 }
 0x1ec   :  { %v812_v2 = vmax.f32 %v810_v31, %v811_v34  ;;  %v825_v63 = vrot.slane %v824_v36, 1  ;;  %v883_v3 = vmax.f32 %v2428_v15, %v2426_v52  ;;  %1828 = vpow2.f32 %v984_v20  ;;  %v2462_v56 = vpop.xlane.xlu0 %781 }
 0x1ed   :  { %v2436_v13 = vpop.eup %1816  ;;  %v1061_v53 = vrot.slane %v1060_v22, 1  ;;  %v1001_v14 = vrot.slane %v1000_v33, 4  ;;  %v871_v10 = vmax.f32 %v869_v55, %v870_v25  ;;  %1830 = vpow2.f32 %v986_v28 }
 0x1ee   :  { %v2438_v27 = vpop.eup %1818  ;;  %v908_v16 = vsub.f32 %v2395_v7, %v812_v2  ;;  %v909_v54 = vsub.f32 %v2393_v30, %v812_v2  ;;  %v826_v48 = vmax.f32 %v824_v36, %v825_v63  ;;  %v884_v8 = vrot.slane %v883_v3, 4 }
 0x1ef   :  { %v1062_v57 = vadd.f32 %v1061_v53, %v1060_v22  ;;  %v1002_v59 = vadd.f32 %v1001_v14, %v1000_v33  ;;  %v1063_v50 = vadd.f32 %v2438_v27, %v2436_v13  ;;  %v872_v26 = vrot.slane %v871_v10, 2 }
 0x1f0   :  { %v944_v17 = vmul.f32 1.442695, %v908_v16  ;;  %v946_v0 = vmul.f32 1.442695, %v909_v54  ;;  %v912_v21 = vsub.f32 %v2402_v18, %v826_v48  ;;  %v913_v23 = vsub.f32 %v2400_v35, %v826_v48 }
 0x1f1   :  { %1832 = vrcp.f32 %v1062_v57  ;;  %v1003_v44 = vrot.slane %v1002_v59, 2  ;;  %v1064_v40 = vrot.slane %v1063_v50, 4  ;;  %v873_v42 = vmax.f32 %v871_v10, %v872_v26 }
 0x1f2   :  { %v2446_v7 = vpop.eup %1820  ;;  %1834 = vpow2.f32 %v944_v17  ;;  %v952_v30 = vmul.f32 1.442695, %v912_v21  ;;  %v954_v12 = vmul.f32 1.442695, %v913_v23  ;;  %v885_v61 = vmax.f32 %v883_v3, %v884_v8 }
 0x1f3   :  { %v2448_v29 = vpop.eup %1822  ;;  %v1004_v32 = vadd.f32 %v1003_v44, %v1002_v59  ;;  %v1065_v24 = vadd.f32 %v1064_v40, %v1063_v50  ;;  %1836 = vpow2.f32 %v946_v0  ;;  %v874_v6 = vrot.slane %v873_v42, 1 }
 0x1f4   :  { %v1070_v18 = vadd.f32 %v2448_v29, %v2446_v7  ;;  %1838 = vpow2.f32 %v952_v30  ;;  %v2452_v35 = vpop.eup %1824  ;;  %v890_v2 = vmax.f32 %v2462_v56, %v2460_v47  ;;  %v886_v10 = vrot.slane %v885_v61, 2 }
 0x1f5   :  { %v1005_v62 = vrot.slane %v1004_v32, 1  ;;  %v1066_v46 = vrot.slane %v1065_v24, 2  ;;  %1840 = vpow2.f32 %v954_v12  ;;  %v875_v55 = vmax.f32 %v873_v42, %v874_v6  ;;  %v2454_v49 = vpop.eup %1826 }
 0x1f6   :  { %v1071_v41 = vrot.slane %v1070_v18, 4  ;;  %v2456_v60 = vpop.eup %1828  ;;  %v1007_v43 = vadd.f32 %v2454_v49, %v2452_v35  ;;  %v887_v30 = vmax.f32 %v885_v61, %v886_v10  ;;  %v891_v6 = vrot.slane %v890_v2, 4 }
 0x1f7   :  { %v1006_v31 = vadd.f32 %v1005_v62, %v1004_v32  ;;  %v1067_v38 = vadd.f32 %v1066_v46, %v1065_v24  ;;  %v2464_v51 = vpop.eup %1830  ;;  %v926_v28 = vsub.f32 %v2416_v1, %v875_v55  ;;  %v927_v34 = vsub.f32 %v2414_v58, %v875_v55 }
 0x1f8   :  { %v1072_v20 = vadd.f32 %v1071_v41, %v1070_v18  ;;  %v1008_v22 = vrot.slane %v1007_v43, 4  ;;  %v1084_v33 = vadd.f32 %v2464_v51, %v2456_v60 }
 0x1f9   :  { %1842 = vrcp.f32 %v1006_v31  ;;  %v1068_v36 = vrot.slane %v1067_v38, 1  ;;  %v980_v48 = vmul.f32 1.442695, %v926_v28  ;;  %v982_v26 = vmul.f32 1.442695, %v927_v34  ;;  %v1904_v28 = vld [vmem:[#allocation2] sm:$0xff] }
 0x1fa   :  { %v1073_v25 = vrot.slane %v1072_v20, 2  ;;  %v1009_v53 = vadd.f32 %v1008_v22, %v1007_v43  ;;  %v1085_v14 = vrot.slane %v1084_v33, 4 }
 0x1fb   :  { %v1833_v63 = vpop.eup %1832  ;;  %v1069_v3 = vadd.f32 %v1068_v36, %v1067_v38  ;;  %v888_v38 = vrot.slane %v887_v30, 1  ;;  %v1905_v36 = vld [vmem:[#allocation2 + $0x8] sm:$0xff] }
 0x1fc   :  { %v2472_v16 = vpop.eup %1834  ;;  %v1144_v58 = vmul.f32 %v1833_v63, %v2404_v37  ;;  %v1145_v1 = vmul.f32 %v1833_v63, %v2408_v19  ;;  %v1074_v54 = vadd.f32 %v1073_v25, %v1072_v20  ;;  %v1010_v59 = vrot.slane %v1009_v53, 2 }
 0x1fd   :  { %v2476_v57 = vpop.eup %1836  ;;  %1844 = vrcp.f32 %v1069_v3  ;;  %v1086_v50 = vadd.f32 %v1085_v14, %v1084_v33  ;;  %v892_v25 = vmax.f32 %v890_v2, %v891_v6 }
 0x1fe   :  { %v2478_v17 = vpop.eup %1838  ;;  %v1176_v0 = vmul.f32 %v1144_v58, %v2146_v4  ;;  %v1177_v21 = vmul.f32 %v1145_v1, %v2150_v5  ;;  %v1456_v23 = vrot.slane %v1144_v58, %v2153_v9  ;;  %v1460_v37 = vrot.slane %v1145_v1, %v2155_v11 }
 0x1ff   :  { %v2484_v44 = vpop.eup %1840  ;;  %v1075_v19 = vrot.slane %v1074_v54, 1  ;;  %v1011_v40 = vadd.f32 %v1010_v59, %v1009_v53  ;;  %v1014_v42 = vadd.f32 %v2476_v57, %v2472_v16  ;;  %v1087_v32 = vrot.slane %v1086_v50, 2 }
 0x200   :  { %v1248_v12 = vadd.f32 %v1177_v21, %v1176_v0  ;;  %v2489_v8 = vsel %vm1388_vm1, %v1460_v37, %v1456_v23  ;;  %1846 = vpow2.f32 %v980_v48  ;;  %v1028_v24 = vadd.f32 %v2484_v44, %v2478_v17  ;;  %v1906_v23 = vld [vmem:[#allocation2 + $0x90] sm:$0xff] }
 0x201   :  { %2881 = vst [vmem:[#allocation11_spill] sm:$0xff] %v2489_v8  ;;  %v1012_v4 = vrot.slane %v1011_v40, 1  ;;  %v1015_v5 = vrot.slane %v1014_v42, 4  ;;  %1848 = vpow2.f32 %v982_v26  ;;  %v1076_v62 = vadd.f32 %v1075_v19, %v1074_v54  ;;  %v1907_v19 = vld [vmem:[#allocation2 + $0x98] sm:$0xff] }
 0x202   :  { %v1088_v43 = vadd.f32 %v1087_v32, %v1086_v50  ;;  %v1029_v20 = vrot.slane %v1028_v24, 4  ;;  %v1249_v14 = vrot.slane %v1248_v12, 4  ;;  %v889_v1 = vmax.f32 %v887_v30, %v888_v38 }
 0x203   :  { %v1843_v18 = vpop.eup %1842  ;;  %v1013_v46 = vadd.f32 %v1012_v4, %v1011_v40  ;;  %v1016_v55 = vadd.f32 %v1015_v5, %v1014_v42  ;;  %v893_v0 = vrot.slane %v892_v25, 2 }
 0x204   :  { %v1128_v41 = vmul.f32 %v1843_v18, %v2424_v45  ;;  %v1129_v31 = vmul.f32 %v1843_v18, %v2430_v39  ;;  %v2497_v45 = vpop.xlane.xlu1 %718  ;;  %v2499_v39 = vpop.xlane.xlu0 %715  ;;  %v1089_v48 = vrot.slane %v1088_v43, 1  ;;  %v1030_v2 = vadd.f32 %v1029_v20, %v1028_v24 }
 0x205   :  { %1850 = vrcp.f32 %v1013_v46  ;;  %v1017_v61 = vrot.slane %v1016_v55, 2  ;;  %v1250_v42 = vadd.f32 %v1249_v14, %v1248_v12  ;;  %v930_v30 = vsub.f32 %v2428_v15, %v889_v1 }
 0x206   :  { %v1160_v34 = vmul.f32 %v1904_v28, %v1128_v41  ;;  %v1161_v22 = vmul.f32 %v1905_v36, %v1129_v31  ;;  %v1382_v33 = vrot.slane %v1128_v41, %v2153_v9  ;;  %v1387_v3 = vrot.slane %v1129_v31, %v2155_v11 }
 0x207   :  { %v1845_v63 = vpop.eup %1844  ;;  %1852 = vrcp.f32 %v1076_v62  ;;  %v1018_v53 = vadd.f32 %v1017_v61, %v1016_v55  ;;  %v1090_v4 = vadd.f32 %v1089_v48, %v1088_v43  ;;  %v1031_v5 = vrot.slane %v1030_v2, 2 }
 0x208   :  { %v1146_v10 = vmul.f32 %v1845_v63, %v2436_v13  ;;  %v1147_v58 = vmul.f32 %v1845_v63, %v2438_v27  ;;  %v2504_v54 = vsel %vm1388_vm1, %v1387_v3, %v1382_v33  ;;  %v1192_v50 = vadd.f32 %v1161_v22, %v1160_v34  ;;  %v2516_v24 = vpop.xlane.xlu1 %730  ;;  %v2518_v6 = vpop.xlane.xlu0 %727 }
 0x209   :  { %v1019_v26 = vrot.slane %v1018_v53, 1  ;;  %v931_v55 = vsub.f32 %v2426_v52, %v889_v1  ;;  %v894_v31 = vmax.f32 %v892_v25, %v893_v0  ;;  %v1251_v15 = vrot.slane %v1250_v42, 2 }
 0x20a   :  { %v2506_v59 = vpop.eup %1846  ;;  %v1178_v37 = vmul.f32 %v1906_v23, %v1146_v10  ;;  %v1179_v40 = vmul.f32 %v1907_v19, %v1147_v58  ;;  %v1465_v13 = vrot.slane %v1146_v10, %v2153_v9  ;;  %v1469_v27 = vrot.slane %v1147_v58, %v2155_v11  ;;  %v1908_v23 = vld [vmem:[#allocation2 + $0xa0] sm:$0xff] }
 0x20b   :  { %v2508_v21 = vpop.eup %1848  ;;  %v1193_v18 = vrot.slane %v1192_v50, 4  ;;  %v1020_v62 = vadd.f32 %v1019_v26, %v1018_v53  ;;  %v988_v38 = vmul.f32 1.442695, %v930_v30  ;;  %v813_v43 = vmax.f32 %v2499_v39, %v2497_v45 }
 0x20c   :  { %v2514_v32 = vsel %vm1388_vm1, %v1469_v27, %v1465_v13  ;;  %v1077_v46 = vadd.f32 %v2508_v21, %v2506_v59  ;;  %v1255_v12 = vadd.f32 %v1179_v40, %v1178_v37  ;;  %1854 = vrcp.f32 %v1090_v4  ;;  %v2529_v53 = vpop.xlane.xlu1 %736  ;;  %v2531_v14 = vpop.xlane.xlu0 %733  ;;  %v1909_v37 = vld [vmem:[#allocation2 + $0xa8] sm:$0xff] }
 0x20d   :  { %2882 = vst [vmem:[#allocation12_spill] sm:$0xff] %v2514_v32  ;;  %v1032_v34 = vadd.f32 %v1031_v5, %v1030_v2  ;;  %v1194_v36 = vadd.f32 %v1193_v18, %v1192_v50  ;;  %1856 = vrcp.f32 %v1020_v62  ;;  %v990_v33 = vmul.f32 1.442695, %v931_v55 }
 0x20e   :  { %v1078_v22 = vrot.slane %v1077_v46, 4  ;;  %v1256_v52 = vrot.slane %v1255_v12, 4  ;;  %v895_v3 = vrot.slane %v894_v31, 1  ;;  %1858 = vpow2.f32 %v988_v38 }
 0x20f   :  { %v1851_v41 = vpop.eup %1850  ;;  %v1033_v58 = vrot.slane %v1032_v34, 1  ;;  %v1195_v1 = vrot.slane %v1194_v36, 2  ;;  %1860 = vpow2.f32 %v990_v33  ;;  %v2542_v2 = vadd.f32 %v1251_v15, %v1250_v42 }
 0x210   :  { %v1130_v20 = vmul.f32 %v1851_v41, %v2452_v35  ;;  %v1131_v28 = vmul.f32 %v1851_v41, %v2454_v49  ;;  %v1079_v48 = vadd.f32 %v1078_v22, %v1077_v46  ;;  %v1257_v50 = vadd.f32 %v1256_v52, %v1255_v12  ;;  %v2548_v27 = vpop.xlane.xlu1 %742  ;;  %v2550_v30 = vpop.xlane.xlu0 %739  ;;  %v1910_v12 = vld [vmem:[#allocation2 + $0x10] sm:$0xff] }
 0x211   :  { %v1853_v61 = vpop.eup %1852  ;;  %v896_v26 = vmax.f32 %v894_v31, %v895_v3  ;;  %v814_v0 = vrot.slane %v813_v43, 4  ;;  %v1034_v19 = vadd.f32 %v1033_v58, %v1032_v34  ;;  %v2552_v42 = vadd.f32 %v1195_v1, %v1194_v36  ;;  %v1911_v31 = vld [vmem:[#allocation2 + $0x18] sm:$0xff] }
 0x212   :  { %v1393_v63 = vrot.slane %v1130_v20, %v2153_v9  ;;  %v1397_v25 = vrot.slane %v1131_v28, %v2155_v11  ;;  %v2534_v35 = vmul.f32 %v1853_v61, %v2446_v7  ;;  %v2537_v49 = vmul.f32 %v1853_v61, %v2448_v29 }
 0x213   :  { %v932_v40 = vsub.f32 %v2462_v56, %v896_v26  ;;  %v933_v13 = vsub.f32 %v2460_v47, %v896_v26  ;;  %v1080_v4 = vrot.slane %v1079_v48, 2  ;;  %v1258_v62 = vrot.slane %v1257_v50, 2 }
 0x214   :  { %v2540_v10 = vsel %vm1388_vm1, %v1397_v25, %v1393_v63  ;;  %v1180_v7 = vmul.f32 %v1908_v23, %v2534_v35  ;;  %v1181_v29 = vmul.f32 %v1909_v37, %v2537_v49  ;;  %v815_v46 = vmax.f32 %v813_v43, %v814_v0  ;;  %v2574_v63 = vpop.xlane.xlu1 %790  ;;  %v2576_v25 = vpop.xlane.xlu0 %787 }
 0x215   :  { %v1162_v56 = vmul.f32 %v1910_v12, %v1130_v20  ;;  %v1163_v47 = vmul.f32 %v1911_v31, %v1131_v28  ;;  %v992_v15 = vmul.f32 1.442695, %v932_v40  ;;  %1862 = vrcp.f32 %v1034_v19  ;;  %v1912_v12 = vld [vmem:[#allocation2 + $0x20] sm:$0xff] }
 0x216   :  { %v2554_v5 = vpop.eup %1854  ;;  %v2557_v41 = vadd.f32 %v1181_v29, %v1180_v7  ;;  %v994_v34 = vmul.f32 1.442695, %v933_v13  ;;  %v1081_v20 = vadd.f32 %v1080_v4, %v1079_v48  ;;  %v2570_v28 = vadd.f32 %v1258_v62, %v1257_v50 }
 0x217   :  { %v1857_v55 = vpop.eup %1856  ;;  %v2568_v22 = vmul.f32 %v2554_v5, %v2456_v60  ;;  %1864 = vpow2.f32 %v992_v15  ;;  %v816_v33 = vrot.slane %v815_v46, 2  ;;  %v827_v52 = vmax.f32 %v2518_v6, %v2516_v24 }
 0x218   :  { %v2563_v36 = vpop.eup %1858  ;;  %1866 = vpow2.f32 %v994_v34  ;;  %v1263_v58 = vrot.slane %v2557_v41, 4  ;;  %v1199_v1 = vadd.f32 %v1163_v47, %v1162_v56  ;;  %v2582_v60 = vmul.f32 %v1857_v55, %v2472_v16 }
 0x219   :  { %v2578_v3 = vpop.eup %1860  ;;  %v834_v48 = vmax.f32 %v2531_v14, %v2529_v53  ;;  %v817_v26 = vmax.f32 %v815_v46, %v816_v33  ;;  %v828_v0 = vrot.slane %v827_v52, 4  ;;  %v841_v23 = vmax.f32 %v2550_v30, %v2548_v27 }
 0x21a   :  { %v1091_v50 = vadd.f32 %v2578_v3, %v2563_v36  ;;  %v2591_v7 = vmul.f32 %v1857_v55, %v2476_v57  ;;  %v1082_v37 = vrot.slane %v1081_v20, 1  ;;  %v897_v16 = vmax.f32 %v2576_v25, %v2574_v63  ;;  %v1913_v55 = vld [vmem:[#allocation2 + $0x28] sm:$0xff] }
 0x21b   :  { %v835_v29 = vrot.slane %v834_v48, 4  ;;  %v818_v40 = vrot.slane %v817_v26, 1  ;;  %v829_v13 = vmax.f32 %v827_v52, %v828_v0  ;;  %v842_v4 = vrot.slane %v841_v23, 4 }
 0x21c   :  { %v1092_v19 = vrot.slane %v1091_v50, 4  ;;  %v1200_v62 = vrot.slane %v1199_v1, 4  ;;  %v1164_v46 = vmul.f32 %v1912_v12, %v2582_v60  ;;  %v898_v31 = vrot.slane %v897_v16, 4 }
 0x21d   :  { %v836_v56 = vmax.f32 %v834_v48, %v835_v29  ;;  %v819_v15 = vmax.f32 %v817_v26, %v818_v40  ;;  %v830_v34 = vrot.slane %v829_v13, 2  ;;  %v843_v57 = vmax.f32 %v841_v23, %v842_v4 }
 0x21e   :  { %v1093_v47 = vadd.f32 %v1092_v19, %v1091_v50  ;;  %v1165_v33 = vmul.f32 %v1913_v55, %v2591_v7  ;;  %v1083_v61 = vadd.f32 %v1082_v37, %v1081_v20  ;;  %v899_v43 = vmax.f32 %v897_v16, %v898_v31 }
 0x21f   :  { %v837_v38 = vrot.slane %v836_v56, 2  ;;  %v1863_v18 = vpop.eup %1862  ;;  %v910_v52 = vsub.f32 %v2499_v39, %v819_v15  ;;  %v911_v0 = vsub.f32 %v2497_v45, %v819_v15  ;;  %v831_v8 = vmax.f32 %v829_v13, %v830_v34 }
 0x220   :  { %v1094_v32 = vrot.slane %v1093_v47, 2  ;;  %v2603_v48 = vmul.f32 %v2554_v5, %v2464_v51  ;;  %v844_v26 = vrot.slane %v843_v57, 2  ;;  %v900_v23 = vrot.slane %v899_v43, 2 }
 0x221   :  { %v2599_v12 = vpop.eup %1864  ;;  %v838_v50 = vmax.f32 %v836_v56, %v837_v38  ;;  %v948_v37 = vmul.f32 1.442695, %v910_v52  ;;  %v950_v16 = vmul.f32 1.442695, %v911_v0  ;;  %v832_v19 = vrot.slane %v831_v8, 1 }
 0x222   :  { %v2605_v29 = vpop.eup %1866  ;;  %v1095_v20 = vadd.f32 %v1094_v32, %v1093_v47  ;;  %v1201_v40 = vadd.f32 %v1200_v62, %v1199_v1  ;;  %1868 = vrcp.f32 %v1083_v61  ;;  %v1206_v13 = vadd.f32 %v1165_v33, %v1164_v46  ;;  %v1914_v47 = vld [vmem:[#allocation2 + $0xc0] sm:$0xff] }
 0x223   :  { %v1098_v45 = vadd.f32 %v2605_v29, %v2599_v12  ;;  %v839_v39 = vrot.slane %v838_v50, 1  ;;  %1870 = vpow2.f32 %v948_v37  ;;  %v845_v51 = vmax.f32 %v843_v57, %v844_v26 }
 0x224   :  { %v1096_v4 = vrot.slane %v1095_v20, 1  ;;  %1872 = vpow2.f32 %v950_v16  ;;  %v833_v38 = vmax.f32 %v831_v8, %v832_v19  ;;  %v1260_v31 = vrot.slane %v2570_v28, 1 }
 0x225   :  { %v1099_v5 = vrot.slane %v1098_v45, 4  ;;  %v840_v56 = vmax.f32 %v838_v50, %v839_v39  ;;  %v2611_v32 = vadd.f32 %v1263_v58, %v2557_v41  ;;  %v1184_v61 = vmul.f32 %v1914_v47, %v2568_v22  ;;  %v1917_v47 = vld [vmem:[#allocation2 + $0x48] sm:$0xff] }
 0x226   :  { %v901_v1 = vmax.f32 %v899_v43, %v900_v23  ;;  %v1097_v62 = vadd.f32 %v1096_v4, %v1095_v20  ;;  %v914_v46 = vsub.f32 %v2518_v6, %v833_v38  ;;  %v915_v34 = vsub.f32 %v2516_v24, %v833_v38  ;;  %v1916_v38 = vld [vmem:[#allocation2 + $0x40] sm:$0xff] }
 0x227   :  { %v1100_v15 = vadd.f32 %v1099_v5, %v1098_v45  ;;  %v1202_v57 = vrot.slane %v1201_v40, 2  ;;  %v916_v55 = vsub.f32 %v2531_v14, %v840_v56  ;;  %v917_v8 = vsub.f32 %v2529_v53, %v840_v56 }
 0x228   :  { %v846_v33 = vrot.slane %v845_v51, 1  ;;  %v1207_v52 = vrot.slane %v1206_v13, 4  ;;  %v956_v41 = vmul.f32 1.442695, %v914_v46  ;;  %v958_v58 = vmul.f32 1.442695, %v915_v34 }
 0x229   :  { %v1101_v0 = vrot.slane %v1100_v15, 2  ;;  %1874 = vrcp.f32 %v1097_v62  ;;  %v960_v50 = vmul.f32 1.442695, %v916_v55  ;;  %v962_v26 = vmul.f32 1.442695, %v917_v8 }
 0x22a   :  { %v847_v43 = vmax.f32 %v845_v51, %v846_v33  ;;  %v2619_v23 = vmul.f32 %v1863_v18, %v2478_v17  ;;  %1876 = vpow2.f32 %v956_v41  ;;  %v902_v24 = vrot.slane %v901_v1, 1  ;;  %v1915_v17 = vld [vmem:[#allocation2 + $0xc8] sm:$0xff] }
 0x22b   :  { %v1102_v6 = vadd.f32 %v1101_v0, %v1100_v15  ;;  %v2622_v20 = vmul.f32 %v1863_v18, %v2484_v44  ;;  %1878 = vpow2.f32 %v958_v58  ;;  %v1208_v16 = vadd.f32 %v1207_v52, %v1206_v13 }
 0x22c   :  { %v918_v53 = vsub.f32 %v2550_v30, %v847_v43  ;;  %v919_v14 = vsub.f32 %v2548_v27, %v847_v43  ;;  %v1869_v37 = vpop.eup %1868  ;;  %1880 = vpow2.f32 %v960_v50  ;;  %v903_v45 = vmax.f32 %v901_v1, %v902_v24  ;;  %v1919_v43 = vld [vmem:[#allocation2 + $0xb8] sm:$0xff] }
 0x22d   :  { %v1103_v19 = vrot.slane %v1102_v6, 1  ;;  %v2626_v39 = vpop.eup %1870  ;;  %v1185_v4 = vmul.f32 %v1915_v17, %v2603_v48  ;;  %1882 = vpow2.f32 %v962_v26  ;;  %v1265_v18 = vrot.slane %v2611_v32, 2 }
 0x22e   :  { %v964_v51 = vmul.f32 1.442695, %v918_v53  ;;  %v966_v5 = vmul.f32 1.442695, %v919_v14  ;;  %v2629_v44 = vpop.eup %1872  ;;  %v1203_v30 = vadd.f32 %v1202_v57, %v1201_v40  ;;  %v934_v27 = vsub.f32 %v2576_v25, %v903_v45 }
 0x22f   :  { %v935_v13 = vsub.f32 %v2574_v63, %v903_v45  ;;  %v1168_v56 = vmul.f32 %v1916_v38, %v2619_v23  ;;  %v1169_v1 = vmul.f32 %v1917_v47, %v2622_v20  ;;  %v1021_v62 = vadd.f32 %v2629_v44, %v2626_v39 }
 0x230   :  { %1884 = vpow2.f32 %v964_v51  ;;  %v1209_v15 = vrot.slane %v1208_v16, 2  ;;  %v1104_v46 = vadd.f32 %v1103_v19, %v1102_v6  ;;  %v996_v34 = vmul.f32 1.442695, %v934_v27 }
 0x231   :  { %v998_v55 = vmul.f32 1.442695, %v935_v13  ;;  %v2639_v40 = vmul.f32 %v1869_v37, %v2506_v59  ;;  %v2642_v63 = vmul.f32 %v1869_v37, %v2508_v21  ;;  %v1022_v25 = vrot.slane %v1021_v62, 4 }
 0x232   :  { %1886 = vpow2.f32 %v966_v5  ;;  %v2644_v57 = vadd.f32 %v1185_v4, %v1184_v61  ;;  %v1402_v8 = vrot.slane %v2582_v60, %v2153_v9  ;;  %v1406_v33 = vrot.slane %v2591_v7, %v2155_v11  ;;  %v1918_v7 = vld [vmem:[#allocation2 + $0xb0] sm:$0xff] }
 0x233   :  { %1888 = vpow2.f32 %v996_v34  ;;  %v1875_v52 = vpop.eup %1874  ;;  %v1220_v0 = vadd.f32 %v1169_v1, %v1168_v56  ;;  %v1023_v41 = vadd.f32 %v1022_v25, %v1021_v62  ;;  %v1261_v59 = vadd.f32 %v1260_v31, %v2570_v28 }
 0x234   :  { %1890 = vpow2.f32 %v998_v55  ;;  %v2653_v21 = vpop.eup %1876  ;;  %v1204_v58 = vrot.slane %v1203_v30, 1  ;;  %v1492_v61 = vrot.slane %v2568_v22, %v2153_v9  ;;  %v1210_v50 = vadd.f32 %v1209_v15, %v1208_v16 }
 0x235   :  { %1892 = vrcp.f32 %v1104_v46  ;;  %v2657_v60 = vpop.eup %1878  ;;  %v1182_v26 = vmul.f32 %v1918_v7, %v2639_v40  ;;  %v1183_v6 = vmul.f32 %v1919_v43, %v2642_v63  ;;  %v1024_v24 = vrot.slane %v1023_v41, 2 }
 0x236   :  { %v2883_v28 = vrot.slane %v2542_v2, 1  ;;  %v2664_v53 = vpop.eup %1880  ;;  %v2667_v14 = vadd.f32 %v1265_v18, %v2611_v32  ;;  %v1277_v37 = vrot.slane %v2644_v57, 4  ;;  %v1420_v16 = vrot.slane %v2619_v23, %v2153_v9 }
 0x237   :  { %v1035_v19 = vadd.f32 %v2657_v60, %v2653_v21  ;;  %v2674_v45 = vpop.eup %1882  ;;  %v1221_v17 = vrot.slane %v1220_v0, 4  ;;  %v1025_v4 = vadd.f32 %v1024_v24, %v1023_v41  ;;  %v2884_v23 = vrot.slane %v2552_v42, 1 }
 0x238   :  { %v1254_v31 = vadd.f32 %v2883_v28, %v2542_v2  ;;  %v2680_v2 = vsel %vm1388_vm1, %v1406_v33, %v1402_v8  ;;  %v1042_v5 = vadd.f32 %v2674_v45, %v2664_v53  ;;  %v1211_v27 = vrot.slane %v1210_v50, 1  ;;  %v1921_v28 = vld [vmem:[#allocation2 + $0xd8] sm:$0xff] }
 0x239   :  { %v1036_v32 = vrot.slane %v1035_v19, 4  ;;  %v2687_v18 = vadd.f32 %v2884_v23, %v2552_v42  ;;  %v1269_v38 = vadd.f32 %v1183_v6, %v1182_v26  ;;  %v1154_v56 = vmul.f32 %v1875_v52, %v2563_v36  ;;  %v1920_v26 = vld [vmem:[#allocation2 + $0xd0] sm:$0xff] }
 0x23a   :  { %v2677_v51 = vsel %vm1320_vm2, %v1261_v59, %v1254_v31  ;;  %v2689_v13 = vpop.eup %1884  ;;  %v1026_v47 = vrot.slane %v1025_v4, 1  ;;  %v2692_v1 = vadd.f32 %v1204_v58, %v1203_v30  ;;  %v1483_v62 = vrot.slane %v2639_v40, %v2153_v9 }
 0x23b   :  { %v1037_v15 = vadd.f32 %v1036_v32, %v1035_v19  ;;  %v1043_v46 = vrot.slane %v1042_v5, 4  ;;  %v2885_v34 = vrot.slane %v2534_v35, %v2153_v9  ;;  %v2886_v42 = vrot.slane %v2537_v49, %v2155_v11 }
 0x23c   :  { %v2705_v25 = vpop.eup %1886  ;;  %v1487_v36 = vrot.slane %v2642_v63, %v2155_v11  ;;  %v1155_v30 = vmul.f32 %v1875_v52, %v2578_v3  ;;  %v1027_v8 = vadd.f32 %v1026_v47, %v1025_v4  ;;  %v1424_v40 = vrot.slane %v2622_v20, %v2155_v11 }
 0x23d   :  { %v2703_v55 = vsel %vm1388_vm1, %v2886_v42, %v2885_v34  ;;  %v2712_v33 = vpop.eup %1888  ;;  %v1038_v35 = vrot.slane %v1037_v15, 2  ;;  %v1044_v41 = vadd.f32 %v1043_v46, %v1042_v5  ;;  %v1049_v49 = vadd.f32 %v2705_v25, %v2689_v13 }
 0x23e   :  { %v2716_v59 = vadd.f32 %v1211_v27, %v1210_v50  ;;  %v2718_v58 = vpop.eup %1890  ;;  %v1270_v7 = vrot.slane %v1269_v38, 4  ;;  %v1186_v63 = vmul.f32 %v1920_v26, %v1154_v56  ;;  %1894 = vrcp.f32 %v1027_v8  ;;  %v1923_v26 = vld [vmem:[#allocation2 + $0xe8] sm:$0xff] }
 0x23f   :  { %v1222_v3 = vadd.f32 %v1221_v17, %v1220_v0  ;;  %v1893_v52 = vpop.eup %1892  ;;  %v1039_v43 = vadd.f32 %v1038_v35, %v1037_v15  ;;  %v1045_v6 = vrot.slane %v1044_v41, 2  ;;  %v1050_v20 = vrot.slane %v1049_v49, 4 }
 0x240   :  { %v1105_v24 = vadd.f32 %v2718_v58, %v2712_v33  ;;  %v1187_v31 = vmul.f32 %v1921_v28, %v1155_v30  ;;  %v1501_v50 = vrot.slane %v1154_v56, %v2153_v9  ;;  %v2724_v19 = vsel %vm1388_vm1, %v1424_v40, %v1420_v16  ;;  %v1922_v40 = vld [vmem:[#allocation2 + $0xe0] sm:$0xff] }
 0x241   :  { %v1488_v4 = vsel %vm1388_vm1, %v1487_v36, %v1483_v62  ;;  %v1040_v32 = vrot.slane %v1039_v43, 1  ;;  %v1046_v5 = vadd.f32 %v1045_v6, %v1044_v41  ;;  %v1051_v0 = vadd.f32 %v1050_v20, %v1049_v49  ;;  %v2887_v6 = vld [vmem:[#allocation11_spill] sm:$0xff]  ;;  %v2888_v20 = vld [vmem:[#allocation12_spill] sm:$0xff] }
 0x242   :  { %v1106_v17 = vrot.slane %v1105_v24, 4  ;;  %v1156_v23 = vmul.f32 %v1893_v52, %v2599_v12  ;;  %v1157_v27 = vmul.f32 %v1893_v52, %v2605_v29  ;;  %v1496_v47 = vrot.slane %v2603_v48, %v2155_v11 }
 0x243   :  { %v1505_v56 = vrot.slane %v1155_v30, %v2155_v11  ;;  %v1041_v15 = vadd.f32 %v1040_v32, %v1039_v43  ;;  %v1047_v16 = vrot.slane %v1046_v5, 1  ;;  %v1052_v46 = vrot.slane %v1051_v0, 2 }
 0x244   :  { %v1107_v34 = vadd.f32 %v1106_v17, %v1105_v24  ;;  %v1271_v62 = vadd.f32 %v1270_v7, %v1269_v38  ;;  %v1223_v42 = vrot.slane %v1222_v3, 2  ;;  %v1497_v12 = vsel %vm1388_vm1, %v1496_v47, %v1492_v61  ;;  %v1924_v17 = vld [vmem:[#allocation2 + $0x30] sm:$0xff] }
 0x245   :  { %v1506_v29 = vsel %vm1388_vm1, %v1505_v56, %v1501_v50  ;;  %1896 = vrcp.f32 %v1041_v15  ;;  %v1048_v36 = vadd.f32 %v1047_v16, %v1046_v5  ;;  %v1053_v48 = vadd.f32 %v1052_v46, %v1051_v0 }
 0x246   :  { %v1108_v8 = vrot.slane %v1107_v34, 2  ;;  %v1283_v30 = vadd.f32 %v1187_v31, %v1186_v63  ;;  %v1188_v35 = vmul.f32 %v1922_v40, %v1156_v23  ;;  %v1510_v41 = vrot.slane %v1156_v23, %v2153_v9 }
 0x247   :  { %v1514_v38 = vrot.slane %v1157_v27, %v2155_v11  ;;  %1898 = vrcp.f32 %v1048_v36  ;;  %v1054_v49 = vrot.slane %v1053_v48, 1  ;;  %v1525_v22 = vsel %vm1320_vm2, %v2540_v10, %v2504_v54 }
 0x248   :  { %v1109_v7 = vadd.f32 %v1108_v8, %v1107_v34  ;;  %v1895_v61 = vpop.eup %1894  ;;  %v1189_v52 = vmul.f32 %v1923_v26, %v1157_v27  ;;  %v1526_v63 = vsel %vm1322_vm3, %v2680_v2, %v1525_v22  ;;  %v1532_v24 = vsel %vm1320_vm2, %v2888_v20, %v2887_v6  ;;  %v1925_v2 = vld [vmem:[#allocation2 + $0x38] sm:$0xff]  ;;  %v1928_v20 = vld [vmem:[#allocation2 + $0x60] sm:$0xff] }
 0x249   :  { %v1515_v43 = vsel %vm1388_vm1, %v1514_v38, %v1510_v41  ;;  %v1134_v28 = vmul.f32 %v1895_v61, %v2626_v39  ;;  %v1135_v31 = vmul.f32 %v1895_v61, %v2629_v44  ;;  %v1055_v50 = vadd.f32 %v1054_v49, %v1053_v48  ;;  %v1927_v61 = vld [vmem:[#allocation2 + $0x58] sm:$0xff] }
 0x24a   :  { %v1110_v32 = vrot.slane %v1109_v7, 1  ;;  %v1272_v5 = vrot.slane %v1271_v62, 2  ;;  %v2750_v54 = vadd.f32 %v1223_v42, %v1222_v3  ;;  %v1284_v10 = vrot.slane %v1283_v30, 4 }
 0x24b   :  { %v1533_v0 = vsel %vm1322_vm3, %v2703_v55, %v1532_v24  ;;  %v1166_v23 = vmul.f32 %v1924_v17, %v1134_v28  ;;  %v1167_v27 = vmul.f32 %v1925_v2, %v1135_v31  ;;  %v1411_v47 = vrot.slane %v1134_v28, %v2153_v9 }
 0x24c   :  { %v1415_v56 = vrot.slane %v1135_v31, %v2155_v11  ;;  %1900 = vrcp.f32 %v1055_v50  ;;  %v1111_v39 = vadd.f32 %v1110_v32, %v1109_v7  ;;  %v1290_v44 = vadd.f32 %v1189_v52, %v1188_v35 }
 0x24d   :  { %v1534_v15 = vsel %vm1324_vm4, %v1488_v4, %v1533_v0  ;;  %v1213_v16 = vadd.f32 %v1167_v27, %v1166_v23  ;;  %v1278_v3 = vadd.f32 %v1277_v37, %v2644_v57  ;;  %v1225_v34 = vrot.slane %v2750_v54, 1 }
 0x24e   :  { %v1416_v55 = vsel %vm1388_vm1, %v1415_v56, %v1411_v47  ;;  %v1535_v46 = vsel %vm1326_vm5, %v1497_v12, %v1534_v15  ;;  %1902 = vrcp.f32 %v1111_v39  ;;  %v1285_v40 = vadd.f32 %v1284_v10, %v1283_v30 }
 0x24f   :  { %v1527_v42 = vsel %vm1324_vm4, %v1416_v55, %v1526_v63  ;;  %v1536_v36 = vsel %vm1328_vm6, %v1506_v29, %v1535_v46  ;;  %v1897_v48 = vpop.eup %1896  ;;  %v1214_v8 = vrot.slane %v1213_v16, 4  ;;  %v1267_v12 = vrot.slane %v2667_v14, 1 }
 0x250   :  { %v1528_v4 = vsel %vm1326_vm5, %v2724_v19, %v1527_v42  ;;  %v2768_v35 = vsel %vm1330_vm7, %v1515_v43, %v1536_v36  ;;  %v1138_v57 = vmul.f32 %v1897_v48, %v2653_v21  ;;  %v1139_v37 = vmul.f32 %v1897_v48, %v2657_v60  ;;  %v1926_v19 = vld [vmem:[#allocation2 + $0x50] sm:$0xff]  ;;  %v1931_v42 = vld [vmem:[#allocation2 + $0x78] sm:$0xff] }
 0x251   :  { %v1291_v41 = vrot.slane %v1290_v44, 4  ;;  %v1899_v38 = vpop.eup %1898  ;;  %v1215_v49 = vadd.f32 %v1214_v8, %v1213_v16  ;;  %v2773_v7 = vadd.f32 %v1272_v5, %v1271_v62  ;;  %v1279_v29 = vrot.slane %v1278_v3, 2  ;;  %v1930_v16 = vld [vmem:[#allocation2 + $0x70] sm:$0xff] }
 0x252   :  { %v2778_v30 = vsel %vm1320_vm2, %v2692_v1, %v2687_v18  ;;  %v1170_v22 = vmul.f32 %v1926_v19, %v1138_v57  ;;  %v1171_v26 = vmul.f32 %v1927_v61, %v1139_v37  ;;  %v1429_v21 = vrot.slane %v1138_v57, %v2153_v9  ;;  %v1929_v1 = vld [vmem:[#allocation2 + $0x68] sm:$0xff] }
 0x253   :  { %v1140_v60 = vmul.f32 %v1899_v38, %v2664_v53  ;;  %v1216_v52 = vrot.slane %v1215_v49, 2  ;;  %v1141_v43 = vmul.f32 %v1899_v38, %v2674_v45  ;;  %v1286_v63 = vrot.slane %v1285_v40, 2 }
 0x254   :  { %v1433_v62 = vrot.slane %v1139_v37, %v2155_v11  ;;  %v1227_v6 = vadd.f32 %v1171_v26, %v1170_v22  ;;  %v1292_v28 = vadd.f32 %v1291_v41, %v1290_v44  ;;  %v1274_v50 = vrot.slane %v2773_v7, 1 }
 0x255   :  { %v1172_v24 = vmul.f32 %v1928_v20, %v1140_v60  ;;  %v1438_v18 = vrot.slane %v1140_v60, %v2153_v9  ;;  %v1173_v31 = vmul.f32 %v1929_v1, %v1141_v43  ;;  %v1442_v53 = vrot.slane %v1141_v43, %v2155_v11 }
 0x256   :  { %v1434_v32 = vsel %vm1388_vm1, %v1433_v62, %v1429_v21  ;;  %v1901_v5 = vpop.eup %1900  ;;  %v1217_v10 = vadd.f32 %v1216_v52, %v1215_v49  ;;  %v1228_v45 = vrot.slane %v1227_v6, 4  ;;  %v2788_v0 = vadd.f32 %v1279_v29, %v1278_v3 }
 0x257   :  { %v1529_v17 = vsel %vm1328_vm6, %v1434_v32, %v1528_v4  ;;  %v1142_v23 = vmul.f32 %v1901_v5, %v2689_v13  ;;  %v1143_v2 = vmul.f32 %v1901_v5, %v2705_v25  ;;  %v1234_v27 = vadd.f32 %v1173_v31, %v1172_v24  ;;  %v1932_v4 = vld [vmem:[#allocation2 + $0xf0] sm:$0xff] }
 0x258   :  { %v1903_v47 = vpop.eup %1902  ;;  %v1229_v56 = vadd.f32 %v1228_v45, %v1227_v6  ;;  %v2793_v39 = vadd.f32 %v1286_v63, %v1285_v40  ;;  %v1293_v44 = vrot.slane %v1292_v28, 2  ;;  %v1443_v15 = vsel %vm1388_vm1, %v1442_v53, %v1438_v18  ;;  %v1933_v40 = vld [vmem:[#allocation2 + $0xf8] sm:$0xff] }
 0x259   :  { %v1174_v55 = vmul.f32 %v1930_v16, %v1142_v23  ;;  %v1158_v3 = vmul.f32 %v1903_v47, %v2712_v33  ;;  %v1159_v46 = vmul.f32 %v1903_v47, %v2718_v58  ;;  %v1175_v36 = vmul.f32 %v1931_v42, %v1143_v2 }
 0x25a   :  { %v1218_v13 = vrot.slane %v1217_v10, 1  ;;  %v1230_v48 = vrot.slane %v1229_v56, 2  ;;  %v1235_v25 = vrot.slane %v1234_v27, 4  ;;  %v1447_v8 = vrot.slane %v1142_v23, %v2153_v9 }
 0x25b   :  { %v1190_v57 = vmul.f32 %v1932_v4, %v1158_v3  ;;  %v1191_v37 = vmul.f32 %v1933_v40, %v1159_v46  ;;  %v1241_v41 = vadd.f32 %v1175_v36, %v1174_v55  ;;  %v1451_v38 = vrot.slane %v1143_v2, %v2155_v11 }
 0x25c   :  { %v1231_v49 = vadd.f32 %v1230_v48, %v1229_v56  ;;  %v1236_v29 = vadd.f32 %v1235_v25, %v1234_v27  ;;  %v1294_v19 = vadd.f32 %v1293_v44, %v1292_v28  ;;  %v1519_v33 = vrot.slane %v1158_v3, %v2153_v9 }
 0x25d   :  { %v1242_v58 = vrot.slane %v1241_v41, 4  ;;  %v1297_v22 = vadd.f32 %v1191_v37, %v1190_v57  ;;  %v1452_v61 = vsel %vm1388_vm1, %v1451_v38, %v1447_v8  ;;  %v1219_v26 = vadd.f32 %v1218_v13, %v1217_v10 }
 0x25e   :  { %v1237_v21 = vrot.slane %v1236_v29, 2  ;;  %v1523_v60 = vrot.slane %v1159_v46, %v2155_v11  ;;  %v1530_v52 = vsel %vm1330_vm7, %v1443_v15, %v1529_v17  ;;  %v1232_v43 = vrot.slane %v1231_v49, 1 }
 0x25f   :  { %v1243_v63 = vadd.f32 %v1242_v58, %v1241_v41  ;;  %v1298_v62 = vrot.slane %v1297_v22, 4  ;;  %v1531_v6 = vsel %vm1332_vm8, %v1452_v61, %v1530_v52  ;;  %v1268_v9 = vadd.f32 %v1267_v12, %v2667_v14 }
 0x260   :  { %v1238_v20 = vadd.f32 %v1237_v21, %v1236_v29  ;;  %v1275_v24 = vadd.f32 %v1274_v50, %v2773_v7  ;;  %v1524_v28 = vsel %vm1388_vm1, %v1523_v60, %v1519_v33  ;;  %1542 = vst.msk [vmem:[#allocation6] sm:$0xff] %vm1541_vm9, %v1531_v6  ;;  %v1288_v18 = vrot.slane %v2793_v39, 1 }
 0x261   :  { %v1244_v11 = vrot.slane %v1243_v63, 2  ;;  %v1299_v1 = vadd.f32 %v1298_v62, %v1297_v22  ;;  %v1538_v31 = vsel %vm1332_vm8, %v1524_v28, %v2768_v35  ;;  %v1281_v14 = vrot.slane %v2788_v0, 1 }
 0x262   :  { %v1239_v32 = vrot.slane %v1238_v20, 1  ;;  %v1295_v12 = vrot.slane %v1294_v19, 1  ;;  %v1323_v7 = vsel %vm1322_vm3, %v2716_v59, %v2778_v30  ;;  %1543 = vst.msk [vmem:[#allocation6 + $0x8] sm:$0xff] %vm1541_vm9, %v1538_v31  ;;  %v1233_v50 = vadd.f32 %v1232_v43, %v1231_v49 }
 0x263   :  { %v1245_v53 = vadd.f32 %v1244_v11, %v1243_v63  ;;  %v1300_v5 = vrot.slane %v1299_v1, 2  ;;  %v1325_v10 = vsel %vm1324_vm4, %v1219_v26, %v1323_v7 }
 0x264   :  { %1967 = shalt.err (!%p1964_p12)
}
 0x265   :  { %s1968_s26 = scalar_lea.hbm %s2880_s7, 256 }
 0x266   :  { %p1969_p13 = scmp.ne.s32.totalorder %s2880_s7, %s1968_s26  ;;  %p1972_p0 = scmp.lt.u32.totalorder %s1968_s26, %s2880_s7 }
 0x268   :  { %p1974_p1 = pnand %p1972_p0, %p1969_p13 }
 0x26a   :  { %1977 = shalt.err (!%p1974_p1)
}
 0x26b   :  { %1567 = dma.vmem_to_hbm [thread:$0]  %s2811_s0, 256, %s2880_s7, [#allocation7], %s2007_s11, %s2007_s11, %s2008_s12   ;;  %v1226_v59 = vadd.f32 %v1225_v34, %v2750_v54  ;;  %v1240_v35 = vadd.f32 %v1239_v32, %v1238_v20  ;;  %v1335_v30 = vsel %vm1322_vm3, %v1268_v9, %v2677_v51  ;;  %v1246_v45 = vrot.slane %v1245_v53, 1 }
 0x26c   :  { %v1289_v17 = vadd.f32 %v1288_v18, %v2793_v39  ;;  %v1301_v23 = vadd.f32 %v1300_v5, %v1299_v1  ;;  %v1336_v2 = vsel %vm1324_vm4, %v1275_v24, %v1335_v30  ;;  %v1282_v27 = vadd.f32 %v1281_v14, %v2788_v0  ;;  %s2011_s7 = smov [#allocation5]  }
 0x26d   :  { %v1296_v47 = vadd.f32 %v1295_v12, %v1294_v19  ;;  %v1327_v56 = vsel %vm1326_vm5, %v1226_v59, %v1325_v10  ;;  %v1247_v44 = vadd.f32 %v1246_v45, %v1245_v53  ;;  %s1549_s9 = sshll.u32 %s2011_s7, 4  ;;  %s1550_s9 = int_to_ptr.vmem [resolvable:$true] %s1549_s9 }
 0x26e   :  { %v1302_v15 = vrot.slane %v1301_v23, 1  ;;  %v1329_v16 = vsel %vm1328_vm6, %v1233_v50, %v1327_v56  ;;  %v1337_v51 = vsel %vm1326_vm5, %v1282_v27, %v1336_v2  ;;  %s1978_s10 = scalar_lea.vmem %s1550_s9, 256  ;;  %p1983_p3 = scmp.lt.s32.totalorder %s1550_s9, %s1550_s9 }
 0x26f   :  { %v1331_v54 = vsel %vm1330_vm7, %v1240_v35, %v1329_v16  ;;  %v1338_v55 = vsel %vm1328_vm6, %v1289_v17, %v1337_v51  ;;  %p1979_p2 = scmp.ne.s32.totalorder %s1550_s9, %s1978_s10  ;;  %p1984_p4 = scmp.lt.s32.totalorder %s1978_s10, %s1978_s10 }
 0x270   :  { %v1303_v34 = vadd.f32 %v1302_v15, %v1301_v23  ;;  %v1333_v39 = vsel %vm1332_vm8, %v1247_v44, %v1331_v54  ;;  %v1339_v0 = vsel %vm1330_vm7, %v1296_v47, %v1338_v55 }
 0x271   :  { %1343 = vst [vmem:[#allocation5] sm:$0xff] %v1333_v39  ;;  %p1985_p5 = por %p1984_p4, %p1983_p3 }
 0x272   :  { %v1340_v3 = vsel %vm1332_vm8, %v1303_v34, %v1339_v0 }
 0x273   :  { %1344 = vst [vmem:[#allocation5 + $0x8] sm:$0xff] %v1340_v3  ;;  %p1986_p6 = pnand %p1985_p5, %p1979_p2 }
 0x275   :  { %1989 = shalt.err (!%p1986_p6)
}
 0x276   :  { %s1990_s15 = scalar_lea.hbm %s2879_s6, 256 }
 0x277   :  { %p1991_p7 = scmp.ne.s32.totalorder %s2879_s6, %s1990_s15  ;;  %p1994_p8 = scmp.lt.u32.totalorder %s1990_s15, %s2879_s6 }
 0x279   :  { %p1996_p9 = pnand %p1994_p8, %p1991_p7 }
 0x27b   :  { %1999 = shalt.err (!%p1996_p9)
}
 0x27c   :  { %1555 = dma.vmem_to_hbm [thread:$0]  %s1550_s9, 256, %s2879_s6, [#allocation4], %s2007_s11, %s2007_s11, %s2008_s12  }
 0x27d   :  { %2002 = dma.done.wait [#allocation4], 256  }
 0x27e   :  { %2003 = vsyncadd [#allocation4], 4294967040 }
 0x27f   :  { %2004 = dma.done.wait [#allocation7], 256  }
 0x280   :  { %2005 = vsyncadd [#allocation7], 4294967040 }
 0x281   :  { %1574 = vsyncpa [#allocation3], 1 }
 0x282   :  { %1575 = vsyncpa [#allocation4], 1 }
 0x283   :  { %1576 = vsyncpa [#allocation7], 1 }

</bundles_post_ra>
